<compile_context>
chip_gen: v7x
topology: tpu7x:2x2x1
jax: 0.10.0
libtpu: 0.0.40
codegen_flags: <defaults>
</compile_context>

<pallas_src>
from functools import partial

import jax
import jax.numpy as jnp
from jax.experimental import pallas as pl
from jax.experimental.pallas import tpu as pltpu


def _upconv_block_kernel(x_ref, w_ref, o_ref, *, K, Wp, Wo, F, eps, neg_slope):
    """One grid step processes `block_n` samples.

    x_ref : (block_n, Ctot, Lin)  flat zero-padded 2x-upsampled image,
                                  Lin = (Hp+1)*Wp (one extra trailing zero row)
    w_ref : (K*K, Cout, Ctot)     per-tap conv weights
    o_ref : (block_n, Cout, F)    F = Ho*Wp (Wp-strided rows; cols >= Wo junk)
    """
    block_n = x_ref.shape[0]
    cout = o_ref.shape[1]
    Ho = F // Wp
    inv_cnt = 1.0 / float(Ho * Wo)

    # Valid-pixel mask along the flat lane axis: (f % Wp) < Wo.
    col = jax.lax.broadcasted_iota(jnp.int32, (cout, F), 1) % Wp
    valid = col < Wo

    w = w_ref[...]                                            # (K*K, Cout, Ctot)

    for b in range(block_n):
        xs = x_ref[b]                                         # (Ctot, Lin)

        # Conv2d(stride=1, bias=False): K*K taps, each a contiguous static
        # lane-slice of the flat padded image, accumulated via MXU dots (f32).
        acc = None
        for kh in range(K):
            for kw in range(K):
                off = kh * Wp + kw
                tap = xs[:, off:off + F]                      # (Ctot, F)
                part = jnp.dot(w[kh * K + kw], tap,
                               preferred_element_type=jnp.float32)
                acc = part if acc is None else acc + part     # (Cout, F)

        # InstanceNorm2d (affine=False): one-pass moments over the Ho*Wo valid
        # pixels (junk columns masked out); biased variance, like PyTorch.
        am = jnp.where(valid, acc, 0.0)
        s1 = jnp.sum(am, axis=1, keepdims=True)
        s2 = jnp.sum(am * am, axis=1, keepdims=True)
        mean = s1 * inv_cnt
        var = jnp.maximum(s2 * inv_cnt - mean * mean, 0.0)
        y = (acc - mean) * jax.lax.rsqrt(var + eps)

        # LeakyReLU(negative_slope)
        y = jnp.maximum(y, neg_slope * y)

        o_ref[b] = y.astype(o_ref.dtype)


def upconv2d_block(x, weight, *, kernel_size, stride, padding, skip=None,
                   eps=1e-5, neg_slope=0.2, compute_dtype=jnp.bfloat16,
                   block_n=1):
    """Forward pass of UpConv2dBlock (norm='in', activation='lrelu',
    pad_type='zero', up_mode='nearest', bias=False).

    x      : (N, C, H, W)        PyTorch NCHW layout
    weight : (Cout, Cin, K, K)   PyTorch Conv2d weight layout
    skip   : optional (N, Cs, 2H, 2W); concatenated as torch.cat((up(x), skip), 1)
    compute_dtype : dtype of the matmul operands (bf16 default: half the DMA
                    bytes, 2x MXU rate; accumulation / norm stay f32).
    block_n : samples packed per grid step (amortizes per-step overhead for
              large N; keep 1 when N is small so both v7x cores get work).
    """
    # TODO(synk): stride > 1 conv path not implemented (block is used with stride=1).
    assert stride == 1, "this kernel implements the stride=1 path"

    out_dtype = x.dtype
    N, Cin, H, W = x.shape
    Cout, Ctot_w, K, K2 = weight.shape
    assert K == K2 == kernel_size
    assert N % block_n == 0

    # Cast matmul operands early (values unchanged by upsample / zero-pad).
    x = x.astype(compute_dtype)

    # Nearest 2x upsample (XLA broadcast+reshape, no gather) + channel concat.
    xu = jnp.repeat(jnp.repeat(x, 2, axis=2), 2, axis=3)
    if skip is not None:
        assert skip.shape[0] == N and skip.shape[2:] == (2 * H, 2 * W)
        xu = jnp.concatenate([xu, skip.astype(compute_dtype)], axis=1)
    Ctot = xu.shape[1]
    assert Ctot == Ctot_w, (Ctot, Ctot_w)

    Hi, Wi = 2 * H, 2 * W
    Ho = Hi + 2 * padding - K + 1
    Wo = Wi + 2 * padding - K + 1
    Hp, Wp = Hi + 2 * padding, Wi + 2 * padding
    assert Ho >= 1 and Wo >= 1

    # Zero-pad (plus one trailing zero row so every in-kernel tap slice stays
    # in bounds) and flatten spatial dims into one contiguous lane axis.
    xp = jnp.pad(xu, ((0, 0), (0, 0),
                      (padding, padding + 1), (padding, padding)))
    Lin = (Hp + 1) * Wp
    xflat = xp.reshape(N, Ctot, Lin)

    F = Ho * Wp      # kernel output is Wp-strided; columns >= Wo are junk

    # (Cout, Ctot, K, K) -> (K*K, Cout, Ctot): one small matmul LHS per tap.
    w_taps = jnp.transpose(weight, (2, 3, 0, 1)).reshape(K * K, Cout, Ctot)
    w_taps = w_taps.astype(compute_dtype)

    kernel = partial(_upconv_block_kernel, K=K, Wp=Wp, Wo=Wo, F=F,
                     eps=eps, neg_slope=neg_slope)

    itemsize = jnp.dtype(compute_dtype).itemsize
    out_itemsize = jnp.dtype(out_dtype).itemsize
    flops = 2 * N * Cout * K * K * Ctot * F
    bytes_accessed = (N * Ctot * Lin * itemsize
                      + K * K * Cout * Ctot * itemsize
                      + N * Cout * F * out_itemsize)

    # Raise the scoped VMEM limit only when the double-buffered blocks need it
    # (defaults: 16/32/32 MiB on v5e/v6e/v7x; 64 MiB physical per v7x core).
    block_bytes = (2 * block_n * (Ctot * Lin * itemsize + Cout * F * out_itemsize)
                   + K * K * Cout * Ctot * itemsize
                   + 4 * Cout * F * 4)
    compiler_kwargs = {}
    if block_bytes > 12 * 1024 * 1024:
        compiler_kwargs["vmem_limit_bytes"] = int(min(2 * block_bytes, 60 << 20))

    out = pl.pallas_call(
        kernel,
        out_shape=jax.ShapeDtypeStruct((N, Cout, F), out_dtype),
        grid_spec=pltpu.PrefetchScalarGridSpec(
            num_scalar_prefetch=0,
            grid=(N // block_n,),
            in_specs=[
                pl.BlockSpec((block_n, Ctot, Lin), lambda n: (n, 0, 0)),
                pl.BlockSpec((K * K, Cout, Ctot), lambda n: (0, 0, 0)),
            ],
            out_specs=pl.BlockSpec((block_n, Cout, F), lambda n: (n, 0, 0)),
        ),
        compiler_params=pltpu.CompilerParams(
            dimension_semantics=("parallel",), **compiler_kwargs),
        cost_estimate=pl.CostEstimate(flops=flops, transcendentals=N * Cout,
                                      bytes_accessed=bytes_accessed),
    )(xflat, w_taps)

    # (N, Cout, Ho*Wp) -> (N, Cout, Ho, Wp) (free reshape) -> drop junk cols.
    return out.reshape(N, Cout, Ho, Wp)[..., :Wo]


def _reference(x, weight, *, padding, skip=None, eps=1e-5, neg_slope=0.2):
    """Pure-JAX reference (XLA conv) for correctness checking."""
    xu = jnp.repeat(jnp.repeat(x, 2, axis=2), 2, axis=3)
    if skip is not None:
        xu = jnp.concatenate([xu, skip], axis=1)
    y = jax.lax.conv_general_dilated(
        xu.astype(jnp.float32), weight.astype(jnp.float32),
        window_strides=(1, 1),
        padding=[(padding, padding), (padding, padding)],
        dimension_numbers=("NCHW", "OIHW", "NCHW"))
    mean = jnp.mean(y, axis=(2, 3), keepdims=True)
    var = jnp.mean((y - mean) ** 2, axis=(2, 3), keepdims=True)
    y = (y - mean) * jax.lax.rsqrt(var + eps)
    return jnp.where(y >= 0, y, neg_slope * y)


if __name__ == "__main__":
    # UpConv2dBlock(input_dim=4, output_dim=8, kernel_size=3, stride=1,
    #               padding=1, norm='in', activation='lrelu',
    #               pad_type='zero', up_mode='nearest')
    N, Cin, H, W = 2, 4, 16, 16
    Cout, K, STRIDE, PAD = 8, 3, 1, 1
    Cskip = 4

    key = jax.random.PRNGKey(0)
    kx, kw, ks, kws = jax.random.split(key, 4)
    x = jax.random.normal(kx, (N, Cin, H, W), dtype=jnp.float32)
    weight = 0.1 * jax.random.normal(kw, (Cout, Cin, K, K), dtype=jnp.float32)
    skip = jax.random.normal(ks, (N, Cskip, 2 * H, 2 * W), dtype=jnp.float32)
    weight_sk = 0.1 * jax.random.normal(
        kws, (Cout, Cin + Cskip, K, K), dtype=jnp.float32)

    run_bf16 = jax.jit(lambda a, w: upconv2d_block(
        a, w, kernel_size=K, stride=STRIDE, padding=PAD))            # bf16 default
    run_f32 = jax.jit(lambda a, w: upconv2d_block(
        a, w, kernel_size=K, stride=STRIDE, padding=PAD,
        compute_dtype=jnp.float32))
    run_skip = jax.jit(lambda a, w, s: upconv2d_block(
        a, w, kernel_size=K, stride=STRIDE, padding=PAD, skip=s,
        compute_dtype=jnp.float32))
    run_packed = jax.jit(lambda a, w: upconv2d_block(
        a, w, kernel_size=K, stride=STRIDE, padding=PAD,
        compute_dtype=jnp.float32, block_n=2))

    ref = _reference(x, weight, padding=PAD)
    ref_sk = _reference(x, weight_sk, padding=PAD, skip=skip)

    # default bf16-operand path (f32 accumulation; loose tolerance)
    out_bf16 = jax.block_until_ready(run_bf16(x, weight))
    assert out_bf16.shape == (N, Cout, 2 * H, 2 * W), out_bf16.shape
    assert jnp.allclose(out_bf16, ref, atol=4e-2, rtol=4e-2), \
        float(jnp.max(jnp.abs(out_bf16 - ref)))

    # f32 matmul path (tight tolerance)
    out_f32 = jax.block_until_ready(run_f32(x, weight))
    assert jnp.allclose(out_f32, ref, atol=1e-3, rtol=1e-3), \
        float(jnp.max(jnp.abs(out_f32 - ref)))

    # skip-connection path (channel order [up(x), skip], as torch.cat)
    out_sk = jax.block_until_ready(run_skip(x, weight_sk, skip))
    assert out_sk.shape == (N, Cout, 2 * H, 2 * W), out_sk.shape
    assert jnp.allclose(out_sk, ref_sk, atol=1e-3, rtol=1e-3), \
        float(jnp.max(jnp.abs(out_sk - ref_sk)))

    # batch-packed path (block_n samples per grid step)
    out_pk = jax.block_until_ready(run_packed(x, weight))
    assert jnp.allclose(out_pk, ref, atol=1e-3, rtol=1e-3), \
        float(jnp.max(jnp.abs(out_pk - ref)))

    print("KERNEL_OK")
</pallas_src>

<mosaic_0001>
module attributes {stable_mosaic.version = 11 : i64} {
  func.func @_upconv_block_kernel(%arg0: i32, %arg1: memref<1x4x1190xbf16, #tpu.memory_space<vmem>>, %arg2: memref<9x8x4xbf16, #tpu.memory_space<vmem>>, %arg3: memref<1x8x1088xf32, #tpu.memory_space<vmem>>) attributes {dimension_semantics = [#tpu.dimension_semantics<parallel>], iteration_bounds = array<i64: 2>, scalar_prefetch = 0 : i64, scratch_operands = 0 : i64, tpu.core_type = #tpu.core_type<tc>, window_params = [{transform_indices = @transform_0, window_bounds = array<i64: 1, 4, 1190>}, {pipeline_mode = #tpu.pipeline_mode<synchronous>, transform_indices = @transform_1, window_bounds = array<i64: 9, 8, 4>}, {transform_indices = @transform_2, window_bounds = array<i64: 1, 8, 1088>}]} {
    %0 = tpu.iota {dimensions = array<i32: 1>} : vector<8x1088xi32>
    %c34_i32 = arith.constant 34 : i32
    %c0_i32 = arith.constant 0 : i32
    %1 = arith.cmpi eq, %c34_i32, %c0_i32 : i32
    %c1_i32 = arith.constant 1 : i32
    %2 = arith.select %1, %c1_i32, %c34_i32 : i32
    %3 = vector.broadcast %2 : i32 to vector<8x1088xi32>
    %4 = arith.remsi %0, %3 : vector<8x1088xi32>
    %c0_i32_0 = arith.constant 0 : i32
    %5 = vector.broadcast %c0_i32_0 : i32 to vector<8x1088xi32>
    %6 = arith.cmpi ne, %4, %5 : vector<8x1088xi32>
    %c0_i32_1 = arith.constant 0 : i32
    %7 = vector.broadcast %c0_i32_1 : i32 to vector<8x1088xi32>
    %8 = arith.cmpi slt, %4, %7 : vector<8x1088xi32>
    %c0_i32_2 = arith.constant 0 : i32
    %9 = arith.cmpi slt, %2, %c0_i32_2 : i32
    %10 = vector.broadcast %9 : i1 to vector<8x1088xi1>
    %11 = vector.broadcast %10 : vector<8x1088xi1> to vector<8x1088xi1>
    %12 = arith.xori %8, %11 : vector<8x1088xi1>
    %13 = arith.andi %12, %6 : vector<8x1088xi1>
    %14 = vector.broadcast %2 : i32 to vector<8x1088xi32>
    %15 = arith.addi %4, %14 : vector<8x1088xi32>
    %16 = arith.select %13, %15, %4 : vector<8x1088xi1>, vector<8x1088xi32>
    %c32_i32 = arith.constant 32 : i32
    %17 = vector.broadcast %c32_i32 : i32 to vector<8x1088xi32>
    %18 = arith.cmpi slt, %16, %17 : vector<8x1088xi32>
    %c0 = arith.constant 0 : index
    %c0_3 = arith.constant 0 : index
    %c0_4 = arith.constant 0 : index
    %19 = vector.load %arg2[%c0, %c0_3, %c0_4] : memref<9x8x4xbf16, #tpu.memory_space<vmem>>, vector<9x8x4xbf16>
    %c0_5 = arith.constant 0 : index
    %c0_6 = arith.constant 0 : index
    %c0_7 = arith.constant 0 : index
    %20 = vector.load %arg1[%c0_5, %c0_6, %c0_7] : memref<1x4x1190xbf16, #tpu.memory_space<vmem>>, vector<1x4x1190xbf16>
    %21 = vector.shape_cast %20 : vector<1x4x1190xbf16> to vector<4x1190xbf16>
    %22 = vector.extract_strided_slice %21 {offsets = [0, 0], sizes = [4, 1088], strides = [1, 1]} : vector<4x1190xbf16> to vector<4x1088xbf16>
    %23 = vector.extract_strided_slice %19 {offsets = [0, 0, 0], sizes = [1, 8, 4], strides = [1, 1, 1]} : vector<9x8x4xbf16> to vector<1x8x4xbf16>
    %24 = vector.shape_cast %23 : vector<1x8x4xbf16> to vector<8x4xbf16>
    %cst = arith.constant dense<0.000000e+00> : vector<8x1088xf32>
    %25 = tpu.matmul %24, %22, %cst {dimension_numbers = #tpu.dot_dimension_numbers<[1], [0], [0], [1], [0, 0, 1, 1], [], []>} : vector<8x4xbf16>, vector<4x1088xbf16>, vector<8x1088xf32> -> vector<8x1088xf32>
    %26 = vector.extract_strided_slice %21 {offsets = [0, 1], sizes = [4, 1088], strides = [1, 1]} : vector<4x1190xbf16> to vector<4x1088xbf16>
    %27 = vector.extract_strided_slice %19 {offsets = [1, 0, 0], sizes = [1, 8, 4], strides = [1, 1, 1]} : vector<9x8x4xbf16> to vector<1x8x4xbf16>
    %28 = vector.shape_cast %27 : vector<1x8x4xbf16> to vector<8x4xbf16>
    %cst_8 = arith.constant dense<0.000000e+00> : vector<8x1088xf32>
    %29 = tpu.matmul %28, %26, %cst_8 {dimension_numbers = #tpu.dot_dimension_numbers<[1], [0], [0], [1], [0, 0, 1, 1], [], []>} : vector<8x4xbf16>, vector<4x1088xbf16>, vector<8x1088xf32> -> vector<8x1088xf32>
    %30 = arith.addf %25, %29 : vector<8x1088xf32>
    %31 = vector.extract_strided_slice %21 {offsets = [0, 2], sizes = [4, 1088], strides = [1, 1]} : vector<4x1190xbf16> to vector<4x1088xbf16>
    %32 = vector.extract_strided_slice %19 {offsets = [2, 0, 0], sizes = [1, 8, 4], strides = [1, 1, 1]} : vector<9x8x4xbf16> to vector<1x8x4xbf16>
    %33 = vector.shape_cast %32 : vector<1x8x4xbf16> to vector<8x4xbf16>
    %cst_9 = arith.constant dense<0.000000e+00> : vector<8x1088xf32>
    %34 = tpu.matmul %33, %31, %cst_9 {dimension_numbers = #tpu.dot_dimension_numbers<[1], [0], [0], [1], [0, 0, 1, 1], [], []>} : vector<8x4xbf16>, vector<4x1088xbf16>, vector<8x1088xf32> -> vector<8x1088xf32>
    %35 = arith.addf %30, %34 : vector<8x1088xf32>
    %36 = vector.extract_strided_slice %21 {offsets = [0, 34], sizes = [4, 1088], strides = [1, 1]} : vector<4x1190xbf16> to vector<4x1088xbf16>
    %37 = vector.extract_strided_slice %19 {offsets = [3, 0, 0], sizes = [1, 8, 4], strides = [1, 1, 1]} : vector<9x8x4xbf16> to vector<1x8x4xbf16>
    %38 = vector.shape_cast %37 : vector<1x8x4xbf16> to vector<8x4xbf16>
    %cst_10 = arith.constant dense<0.000000e+00> : vector<8x1088xf32>
    %39 = tpu.matmul %38, %36, %cst_10 {dimension_numbers = #tpu.dot_dimension_numbers<[1], [0], [0], [1], [0, 0, 1, 1], [], []>} : vector<8x4xbf16>, vector<4x1088xbf16>, vector<8x1088xf32> -> vector<8x1088xf32>
    %40 = arith.addf %35, %39 : vector<8x1088xf32>
    %41 = vector.extract_strided_slice %21 {offsets = [0, 35], sizes = [4, 1088], strides = [1, 1]} : vector<4x1190xbf16> to vector<4x1088xbf16>
    %42 = vector.extract_strided_slice %19 {offsets = [4, 0, 0], sizes = [1, 8, 4], strides = [1, 1, 1]} : vector<9x8x4xbf16> to vector<1x8x4xbf16>
    %43 = vector.shape_cast %42 : vector<1x8x4xbf16> to vector<8x4xbf16>
    %cst_11 = arith.constant dense<0.000000e+00> : vector<8x1088xf32>
    %44 = tpu.matmul %43, %41, %cst_11 {dimension_numbers = #tpu.dot_dimension_numbers<[1], [0], [0], [1], [0, 0, 1, 1], [], []>} : vector<8x4xbf16>, vector<4x1088xbf16>, vector<8x1088xf32> -> vector<8x1088xf32>
    %45 = arith.addf %40, %44 : vector<8x1088xf32>
    %46 = vector.extract_strided_slice %21 {offsets = [0, 36], sizes = [4, 1088], strides = [1, 1]} : vector<4x1190xbf16> to vector<4x1088xbf16>
    %47 = vector.extract_strided_slice %19 {offsets = [5, 0, 0], sizes = [1, 8, 4], strides = [1, 1, 1]} : vector<9x8x4xbf16> to vector<1x8x4xbf16>
    %48 = vector.shape_cast %47 : vector<1x8x4xbf16> to vector<8x4xbf16>
    %cst_12 = arith.constant dense<0.000000e+00> : vector<8x1088xf32>
    %49 = tpu.matmul %48, %46, %cst_12 {dimension_numbers = #tpu.dot_dimension_numbers<[1], [0], [0], [1], [0, 0, 1, 1], [], []>} : vector<8x4xbf16>, vector<4x1088xbf16>, vector<8x1088xf32> -> vector<8x1088xf32>
    %50 = arith.addf %45, %49 : vector<8x1088xf32>
    %51 = vector.extract_strided_slice %21 {offsets = [0, 68], sizes = [4, 1088], strides = [1, 1]} : vector<4x1190xbf16> to vector<4x1088xbf16>
    %52 = vector.extract_strided_slice %19 {offsets = [6, 0, 0], sizes = [1, 8, 4], strides = [1, 1, 1]} : vector<9x8x4xbf16> to vector<1x8x4xbf16>
    %53 = vector.shape_cast %52 : vector<1x8x4xbf16> to vector<8x4xbf16>
    %cst_13 = arith.constant dense<0.000000e+00> : vector<8x1088xf32>
    %54 = tpu.matmul %53, %51, %cst_13 {dimension_numbers = #tpu.dot_dimension_numbers<[1], [0], [0], [1], [0, 0, 1, 1], [], []>} : vector<8x4xbf16>, vector<4x1088xbf16>, vector<8x1088xf32> -> vector<8x1088xf32>
    %55 = arith.addf %50, %54 : vector<8x1088xf32>
    %56 = vector.extract_strided_slice %21 {offsets = [0, 69], sizes = [4, 1088], strides = [1, 1]} : vector<4x1190xbf16> to vector<4x1088xbf16>
    %57 = vector.extract_strided_slice %19 {offsets = [7, 0, 0], sizes = [1, 8, 4], strides = [1, 1, 1]} : vector<9x8x4xbf16> to vector<1x8x4xbf16>
    %58 = vector.shape_cast %57 : vector<1x8x4xbf16> to vector<8x4xbf16>
    %cst_14 = arith.constant dense<0.000000e+00> : vector<8x1088xf32>
    %59 = tpu.matmul %58, %56, %cst_14 {dimension_numbers = #tpu.dot_dimension_numbers<[1], [0], [0], [1], [0, 0, 1, 1], [], []>} : vector<8x4xbf16>, vector<4x1088xbf16>, vector<8x1088xf32> -> vector<8x1088xf32>
    %60 = arith.addf %55, %59 : vector<8x1088xf32>
    %61 = vector.extract_strided_slice %21 {offsets = [0, 70], sizes = [4, 1088], strides = [1, 1]} : vector<4x1190xbf16> to vector<4x1088xbf16>
    %62 = vector.extract_strided_slice %19 {offsets = [8, 0, 0], sizes = [1, 8, 4], strides = [1, 1, 1]} : vector<9x8x4xbf16> to vector<1x8x4xbf16>
    %63 = vector.shape_cast %62 : vector<1x8x4xbf16> to vector<8x4xbf16>
    %cst_15 = arith.constant dense<0.000000e+00> : vector<8x1088xf32>
    %64 = tpu.matmul %63, %61, %cst_15 {dimension_numbers = #tpu.dot_dimension_numbers<[1], [0], [0], [1], [0, 0, 1, 1], [], []>} : vector<8x4xbf16>, vector<4x1088xbf16>, vector<8x1088xf32> -> vector<8x1088xf32>
    %65 = arith.addf %60, %64 : vector<8x1088xf32>
    %cst_16 = arith.constant 0.000000e+00 : f32
    %66 = vector.broadcast %cst_16 : f32 to vector<8x1088xf32>
    %67 = arith.select %18, %65, %66 : vector<8x1088xi1>, vector<8x1088xf32>
    %cst_17 = arith.constant dense<0.000000e+00> : vector<8xf32>
    %68 = vector.multi_reduction <add>, %67, %cst_17 [1] : vector<8x1088xf32> to vector<8xf32>
    %69 = vector.shape_cast %68 : vector<8xf32> to vector<8x1xf32>
    %70 = arith.mulf %67, %67 : vector<8x1088xf32>
    %cst_18 = arith.constant dense<0.000000e+00> : vector<8xf32>
    %71 = vector.multi_reduction <add>, %70, %cst_18 [1] : vector<8x1088xf32> to vector<8xf32>
    %72 = vector.shape_cast %71 : vector<8xf32> to vector<8x1xf32>
    %cst_19 = arith.constant 9.765625E-4 : f32
    %73 = vector.broadcast %cst_19 : f32 to vector<8x1xf32>
    %74 = arith.mulf %69, %73 : vector<8x1xf32>
    %cst_20 = arith.constant 9.765625E-4 : f32
    %75 = vector.broadcast %cst_20 : f32 to vector<8x1xf32>
    %76 = arith.mulf %72, %75 : vector<8x1xf32>
    %77 = arith.mulf %74, %74 : vector<8x1xf32>
    %78 = arith.subf %76, %77 : vector<8x1xf32>
    %cst_21 = arith.constant 0.000000e+00 : f32
    %79 = vector.broadcast %cst_21 : f32 to vector<8x1xf32>
    %80 = arith.maximumf %78, %79 : vector<8x1xf32>
    %81 = vector.broadcast %74 : vector<8x1xf32> to vector<8x1088xf32>
    %82 = arith.subf %65, %81 : vector<8x1088xf32>
    %cst_22 = arith.constant 9.99999974E-6 : f32
    %83 = vector.broadcast %cst_22 : f32 to vector<8x1xf32>
    %84 = arith.addf %80, %83 : vector<8x1xf32>
    %85 = math.rsqrt %84 : vector<8x1xf32>
    %86 = vector.broadcast %85 : vector<8x1xf32> to vector<8x1088xf32>
    %87 = arith.mulf %82, %86 : vector<8x1088xf32>
    %cst_23 = arith.constant 2.000000e-01 : f32
    %88 = vector.broadcast %cst_23 : f32 to vector<8x1088xf32>
    %89 = arith.mulf %88, %87 : vector<8x1088xf32>
    %90 = arith.maximumf %87, %89 : vector<8x1088xf32>
    %c0_24 = arith.constant 0 : index
    %c0_25 = arith.constant 0 : index
    %c0_26 = arith.constant 0 : index
    %91 = vector.load %arg3[%c0_24, %c0_25, %c0_26] : memref<1x8x1088xf32, #tpu.memory_space<vmem>>, vector<1x8x1088xf32>
    %92 = vector.shape_cast %91 : vector<1x8x1088xf32> to vector<8x1088xf32>
    %93 = vector.shape_cast %90 : vector<8x1088xf32> to vector<1x8x1088xf32>
    tpu.vector_store %arg3[%c0_24, %c0_25, %c0_26], %93 {strides = array<i32>} : memref<1x8x1088xf32, #tpu.memory_space<vmem>>, vector<1x8x1088xf32>,
    return
  }
  func.func @transform_0(%arg0: i32) -> (i32, i32, i32) {
    %c0_i32 = arith.constant 0 : i32
    %c0_i32_0 = arith.constant 0 : i32
    %c0_i32_1 = arith.constant 0 : i32
    return %arg0, %c0_i32, %c0_i32_0 : i32, i32, i32
  }
  func.func @transform_1(%arg0: i32) -> (i32, i32, i32) {
    %c0_i32 = arith.constant 0 : i32
    %c0_i32_0 = arith.constant 0 : i32
    %c0_i32_1 = arith.constant 0 : i32
    %c0_i32_2 = arith.constant 0 : i32
    return %c0_i32, %c0_i32_0, %c0_i32_1 : i32, i32, i32
  }
  func.func @transform_2(%arg0: i32) -> (i32, i32, i32) {
    %c0_i32 = arith.constant 0 : i32
    %c0_i32_0 = arith.constant 0 : i32
    %c0_i32_1 = arith.constant 0 : i32
    return %arg0, %c0_i32, %c0_i32_0 : i32, i32, i32
  }
}

</mosaic_0001>

<bundles_post_ra>
// kernel: _lambda_.1
= control target key start
LH: loop header
LB: loop body
LE: loop exit
PB: predicated region body
PF: predicated region fallthrough
CT: control target
= control target key end

     0   :  { %s3304_s9 = smov 0   ;;  %s4076_s0 = inlined_call_operand.vmem [shape: bf16[2,4,1190], index: 0, kind: input, shape index: {}]   ;;  %s4077_s1 = inlined_call_operand.vmem [shape: bf16[9,8,4], index: 1, kind: input, shape index: {}]   ;;  %s4078_s2 = inlined_call_operand.vmem [shape: f32[2,8,1088], index: 2, kind: output, shape index: {}]  }
   0x1 LB: > { %s2909_s10 = sadd.s32 4294967295, %s3275_s9   ;;  %p2913_p0 = scmp.ge.s32.totalorder %s3275_s9, 1  ;;  %s3275_s9 = sphi %s3304_s9, %s12_s9  }
   0x2   : > { %p112_p1 = scmp.lt.s32.totalorder %s3275_s9, 3 }
   0x4   : > { %p113_p2 = pnand %p2913_p0, %p112_p1 }
   0x5   : > { %p134_p3 = scmp.lt.s32.totalorder (!%p113_p2), %s2909_s10, 1  ;;  %v145_v0 = vlaneseq (!%p113_p2)  ;;  %v3277_v1 = vmov (!%p113_p2), 1983009808   ;;  %v3278_v3 = vmov (!%p113_p2), 0   ;;  %vm395_vm0 = vcmask (!%p113_p2), 1041408   ;;  %s3279_s15 = smov (!%p113_p2), 127  }
   0x6   : > { %116 = sbr.rel (%p113_p2) target bundleno = 708 (0x2c4), region = 28  ;;  %v325_v2 = vunpack.c.l.s4 (!%p113_p2), %v3277_v1  ;;  %771 = vmatprep.mubr.bf16.mxu0 (!%p113_p2), %v3278_v3  ;;  %455 = vmatprep.mubr.bf16.mxu1 (!%p113_p2), %v3278_v3  ;;  %v3346_v16 = vld [vmem:[%s4077_s1] sm:$0xf] (!%p113_p2)  ;;  %vm391_vm1 = vcmask (!%p113_p2), 31744   ;;  %v3280_v18 = vmov (!%p113_p2), 0.0   ;;  %s3281_s18 = smov (!%p113_p2), 126  }
   0x7   : > { %v328_v4 = vshrl.u32 (!%p113_p2), %v145_v0, 7  ;;  %vm3282_vm2 = vmmov (!%p113_p2), 0   ;;  %s3283_s19 = smov (!%p113_p2), 94   ;;  %s3284_s20 = smov (!%p113_p2), 93   ;;  %vm382_vm3 = vcmask (!%p113_p2), 1039360   ;;  %vm879_vm4 = vcmask (!%p113_p2), 1031168  }
   0x8   : > { %v326_v5 = vunpack.c.0.s8 (!%p113_p2), %v325_v2  ;;  %s3285_s21 = smov (!%p113_p2), 92   ;;  %s3286_s22 = smov (!%p113_p2), 60   ;;  %v3462_v32 = vld [vmem:[%s4077_s1 + $0x4] sm:$0xf] (!%p113_p2)  ;;  %v3492_v45 = vld [vmem:[%s4077_s1 + $0x8] sm:$0xf] (!%p113_p2) }
   0x9   : > { %s3287_s23 = smov (!%p113_p2), 59   ;;  %s3288_s26 = smov (!%p113_p2), 58   ;;  %vm1149_vm5 = vcmask (!%p113_p2), 769024   ;;  %vm1419_vm6 = vcmask (!%p113_p2), 760832   ;;  %vm1689_vm7 = vcmask (!%p113_p2), 752640   ;;  %vm1962_vm8 = vcmask (!%p113_p2), 490496  }
   0xa   : > { %v329_v6 = vsub.s32 (!%p113_p2), %v326_v5, %v328_v4  ;;  %vm2235_vm9 = vcmask (!%p113_p2), 482304   ;;  %vm2508_vm10 = vcmask (!%p113_p2), 474112  }
   0xd   : > { %s4106_s10 = smov (!%p134_p3, %s2909_s10), 1 }
   0xe   : > { %s3225_s11 = smul.u32 20, %s4106_s10 }
  0x10   : > { %s138_s14 = scalar_lea.vmem %s4076_s0, %s3225_s11 }
  0x11   : > { %v317_v7 = vld [vmem:[%s138_s14] sm:$0xff]  ;;  %v318_v8 = vld [vmem:[%s138_s14 + $0x8] sm:$0xff]  ;;  %v3348_v17 = vld.sshfl [vmem:[%s138_s14 + $0x10] sm:$0x33 pattern:$0x76325410] }
  0x12   : > { %v3321_v9 = vrot.slane %v317_v7, %v329_v6  ;;  %v323_v10 = vcombine.high %v317_v7, %v317_v7  ;;  %v3323_v11 = vrot.slane %v318_v8, %v329_v6  ;;  %v655_v19 = vsel %vm395_vm0, %v3348_v17, 0 }
  0x13   : > { %v340_v21 = vcombine.high %v318_v8, %v318_v8  ;;  %v3437_v24 = vcombine.high %v3348_v17, %v3348_v17 }
  0x14   : > { %364 = vrot.lane.b32.xlu0 %v3321_v9, %s3279_s15  ;;  %v3327_v12 = vrot.slane %v323_v10, %v329_v6  ;;  %v3331_v13 = vcombine.high %v3321_v9, %v3321_v9  ;;  %v3335_v14 = vcombine.high %v3323_v11, %v3323_v11  ;;  %v643_v15 = vsel %vm395_vm0, %v3323_v11, 0 }
  0x15   : > { %v3373_v22 = vrot.slane %v340_v21, %v329_v6  ;;  %v631_v10 = vsel %vm395_vm0, %v3321_v9, 0 }
  0x16   : > { %368 = vrot.lane.b32.xlu1 %v3327_v12, %s3279_s15  ;;  %2930 = vmatprep.subr.msk.bf16.mxu0 %vm395_vm0, %v3335_v14  ;;  %v3359_v20 = vcombine.high %v3327_v12, %v3327_v12 }
  0x17   : > { %740 = vmatpush1.bf16.msra.mxu0 %v643_v15  ;;  %v3388_v23 = vcombine.high %v3373_v22, %v3373_v22  ;;  %v3580_v15 = vld [vmem:[%s4077_s1 + $0xc] sm:$0xf] }
  0x18   : > { %366 = vrot.lane.b32.xlu0 %v3331_v13, %s3279_s15  ;;  %3024 = vmatprep.subr.bf16.mxu0 %v3280_v18 }
  0x1a   : > { %861 = vrot.lane.b32.xlu1 %v3321_v9, %s3281_s18  ;;  %2931 = vmatmul.mubr.msk.bf16.vlgmr.msra.gmra.mrb[0].mxu0 %vm391_vm1, %v3346_v16 }
  0x1b   : > { %3025 = vmatpush3.bf16.msra.mxu0 %v655_v19  ;;  %3026 = vmatprep.mubr.msk.bf16.mxu0 %vm3282_vm2, %v3280_v18 }
  0x1c   : > { %372 = vrot.lane.b32.xlu0 %v3323_v11, %s3279_s15 }
  0x1e   : > { %370 = vrot.lane.b32.xlu1 %v3359_v20, %s3279_s15 }
  0x20   : > { %863 = vrot.lane.b32.xlu0 %v3331_v13, %s3281_s18 }
  0x22   : > { %865 = vrot.lane.b32.xlu1 %v3327_v12, %s3281_s18  ;;  %3027 = vmatmul.mubr.msk.bf16.vlgmr.msra.gmra.mrb[4].mxu0 %vm391_vm1, %v3346_v16 }
  0x23   : > { %950 = vmatprep.mubr.bf16.mxu0 %v3278_v3 }
  0x24   : > { %374 = vrot.lane.b32.xlu0 %v3335_v14, %s3279_s15 }
  0x26   : > { %376 = vrot.lane.b32.xlu1 %v3373_v22, %s3279_s15 }
  0x28   : > { %869 = vrot.lane.b32.xlu0 %v3323_v11, %s3281_s18 }
  0x2a   : > { %871 = vrot.lane.b32.xlu1 %v3335_v14, %s3281_s18 }
  0x2c   : > { %873 = vrot.lane.b32.xlu0 %v3373_v22, %s3281_s18 }
  0x2e   : > { %378 = vrot.lane.b32.xlu1 %v3388_v23, %s3279_s15 }
  0x30   : > { %380 = vrot.lane.b32.xlu0 %v3348_v17, %s3279_s15  ;;  %s3226_s15 = smul.u32 72, %s4106_s10 }
  0x32   : > { %877 = vrot.lane.b32.xlu1 %v3348_v17, %s3281_s18  ;;  %s143_s10 = scalar_lea.vmem %s4078_s2, %s3226_s15 }
  0x34   : > { %1131 = vrot.lane.b32.xlu0 %v3321_v9, %s3283_s19 }
  0x36   : > { %1133 = vrot.lane.b32.xlu1 %v3331_v13, %s3283_s19 }
  0x38   : > { %1135 = vrot.lane.b32.xlu0 %v3327_v12, %s3283_s19 }
  0x3a   : > { %1139 = vrot.lane.b32.xlu1 %v3323_v11, %s3283_s19 }
  0x3c   : > { %1141 = vrot.lane.b32.xlu0 %v3335_v14, %s3283_s19 }
  0x3e   : > { %1143 = vrot.lane.b32.xlu1 %v3373_v22, %s3283_s19 }
  0x40   : > { %1147 = vrot.lane.b32.xlu0 %v3348_v17, %s3283_s19 }
  0x42   : > { %1401 = vrot.lane.b32.xlu1 %v3321_v9, %s3284_s20 }
  0x44   : > { %1403 = vrot.lane.b32.xlu0 %v3331_v13, %s3284_s20 }
  0x46   : > { %1405 = vrot.lane.b32.xlu1 %v3327_v12, %s3284_s20 }
  0x48   : > { %867 = vrot.lane.b32.xlu0 %v3359_v20, %s3281_s18 }
  0x4a   : > { %1409 = vrot.lane.b32.xlu1 %v3323_v11, %s3284_s20 }
  0x4c   : > { %1411 = vrot.lane.b32.xlu0 %v3335_v14, %s3284_s20 }
  0x4e   : > { %1413 = vrot.lane.b32.xlu1 %v3373_v22, %s3284_s20 }
  0x50   : > { %875 = vrot.lane.b32.xlu0 %v3388_v23, %s3281_s18 }
  0x52   : > { %1417 = vrot.lane.b32.xlu1 %v3348_v17, %s3284_s20 }
  0x54   : > { %1137 = vrot.lane.b32.xlu0 %v3359_v20, %s3283_s19 }
  0x56   : > { %1671 = vrot.lane.b32.xlu1 %v3321_v9, %s3285_s21 }
  0x58   : > { %1673 = vrot.lane.b32.xlu0 %v3331_v13, %s3285_s21 }
  0x5a   : > { %1675 = vrot.lane.b32.xlu1 %v3327_v12, %s3285_s21 }
  0x5c   : > { %1145 = vrot.lane.b32.xlu0 %v3388_v23, %s3283_s19 }
  0x5e   : > { %1679 = vrot.lane.b32.xlu1 %v3323_v11, %s3285_s21 }
  0x60   : > { %1681 = vrot.lane.b32.xlu0 %v3335_v14, %s3285_s21 }
  0x62   : > { %1683 = vrot.lane.b32.xlu1 %v3373_v22, %s3285_s21 }
  0x64   : > { %1407 = vrot.lane.b32.xlu0 %v3359_v20, %s3284_s20 }
  0x66   : > { %1687 = vrot.lane.b32.xlu1 %v3348_v17, %s3285_s21 }
  0x68   : > { %1415 = vrot.lane.b32.xlu0 %v3388_v23, %s3284_s20 }
  0x6a   : > { %1942 = vrot.lane.b32.xlu1 %v3321_v9, %s3286_s22 }
  0x6c   : > { %1944 = vrot.lane.b32.xlu0 %v3331_v13, %s3286_s22 }
  0x6e   : > { %1946 = vrot.lane.b32.xlu1 %v3327_v12, %s3286_s22 }
  0x70   : > { %1677 = vrot.lane.b32.xlu0 %v3359_v20, %s3285_s21 }
  0x72   : > { %1950 = vrot.lane.b32.xlu1 %v3323_v11, %s3286_s22 }
  0x74   : > { %1952 = vrot.lane.b32.xlu0 %v3335_v14, %s3286_s22 }
  0x76   : > { %1954 = vrot.lane.b32.xlu1 %v3373_v22, %s3286_s22 }
  0x78   : > { %1685 = vrot.lane.b32.xlu0 %v3388_v23, %s3285_s21 }
  0x7a   : > { %1958 = vrot.lane.b32.xlu1 %v3348_v17, %s3286_s22 }
  0x7c   : > { %1960 = vrot.lane.b32.xlu0 %v3437_v24, %s3286_s22 }
  0x7e   : > { %1948 = vrot.lane.b32.xlu1 %v3359_v20, %s3286_s22 }
  0x80   : > { %2215 = vrot.lane.b32.xlu0 %v3321_v9, %s3287_s23 }
  0x82   : > { %2217 = vrot.lane.b32.xlu1 %v3331_v13, %s3287_s23 }
  0x84   : > { %2219 = vrot.lane.b32.xlu0 %v3327_v12, %s3287_s23 }
  0x86   : > { %v365_v25 = vpop.permute.xlu0 %364  ;;  %1956 = vrot.lane.b32.xlu1 %v3388_v23, %s3286_s22 }
  0x88   : > { %v369_v26 = vpop.permute.xlu1 %368  ;;  %2223 = vrot.lane.b32.xlu0 %v3323_v11, %s3287_s23 }
  0x8a   : > { %v367_v27 = vpop.permute.xlu0 %366  ;;  %2225 = vrot.lane.b32.xlu1 %v3335_v14, %s3287_s23 }
  0x8b   : > { %v384_v28 = vsel %vm382_vm3, %v367_v27, %v369_v26  ;;  %v383_v29 = vsel %vm382_vm3, %v365_v25, %v367_v27 }
  0x8c   : > { %2917 = vmatprep.subr.msk.bf16.mxu1 %vm395_vm0, %v384_v28  ;;  %v862_v30 = vpop.permute.xlu1 %861  ;;  %v397_v31 = vsel %vm395_vm0, %v383_v29, 0  ;;  %2227 = vrot.lane.b32.xlu0 %v3373_v22, %s3287_s23  ;;  %v649_v29 = vsel %vm395_vm0, %v3373_v22, 0 }
  0x8d   : > { %424 = vmatpush1.bf16.msra.mxu1 %v397_v31 }
  0x8e   : > { %v373_v33 = vpop.permute.xlu0 %372  ;;  %2221 = vrot.lane.b32.xlu1 %v3359_v20, %s3287_s23 }
  0x90   : > { %2918 = vmatmul.mubr.msk.bf16.vlgmr.msra.gmra.mrb[0].mxu1 %vm391_vm1, %v3462_v32  ;;  %v371_v34 = vpop.permute.xlu1 %370  ;;  %2231 = vrot.lane.b32.xlu0 %v3348_v17, %s3287_s23 }
  0x91   : > { %v385_v35 = vsel %vm382_vm3, %v369_v26, %v371_v34  ;;  %v386_v36 = vsel %vm382_vm3, %v371_v34, %v373_v33  ;;  %496 = vmatprep.mubr.bf16.mxu1 %v3278_v3 }
  0x92   : > { %v403_v37 = vsel %vm395_vm0, %v385_v35, 0  ;;  %v864_v38 = vpop.permute.xlu0 %863  ;;  %2919 = vmatprep.subr.msk.bf16.mxu1 %vm395_vm0, %v386_v36  ;;  %2233 = vrot.lane.b32.xlu1 %v3437_v24, %s3287_s23 }
  0x93   : > { %v880_v39 = vsel %vm879_vm4, %v862_v30, %v864_v38  ;;  %465 = vmatpush1.bf16.msra.mxu1 %v403_v37 }
  0x94   : > { %v3478_v40 = vpop.permute.xlu1 %865  ;;  %2229 = vrot.lane.b32.xlu0 %v3388_v23, %s3287_s23  ;;  %v892_v42 = vsel %vm395_vm0, %v880_v39, 0 }
  0x95   : > { %v881_v41 = vsel %vm879_vm4, %v864_v38, %v3478_v40 }
  0x96   : > { %v375_v43 = vpop.permute.xlu0 %374  ;;  %2935 = vmatprep.subr.msk.bf16.mxu0 %vm395_vm0, %v881_v41  ;;  %2488 = vrot.lane.b32.xlu1 %v3321_v9, %s3288_s26 }
  0x97   : > { %v387_v44 = vsel %vm382_vm3, %v373_v33, %v375_v43  ;;  %919 = vmatpush1.bf16.msra.mxu0 %v892_v42 }
  0x98   : > { %2920 = vmatmul.mubr.msk.bf16.vlgmr.msra.gmra.mrb[4].mxu1 %vm391_vm1, %v3462_v32  ;;  %v377_v46 = vpop.permute.xlu1 %376  ;;  %2490 = vrot.lane.b32.xlu0 %v3331_v13, %s3288_s26  ;;  %v409_v48 = vsel %vm395_vm0, %v387_v44, 0 }
  0x99   : > { %v388_v47 = vsel %vm382_vm3, %v375_v43, %v377_v46  ;;  %537 = vmatprep.mubr.bf16.mxu1 %v3278_v3 }
  0x9a   : > { %v3501_v49 = vpop.permute.xlu0 %869  ;;  %2921 = vmatprep.subr.msk.bf16.mxu1 %vm395_vm0, %v388_v47  ;;  %2936 = vmatmul.mubr.msk.bf16.vlgmr.msra.gmra.mrb[8].mxu0 %vm391_vm1, %v3492_v45 }
  0x9b   : > { %506 = vmatpush1.bf16.msra.mxu1 %v409_v48  ;;  %1032 = vmatprep.mubr.bf16.mxu0 %v3278_v3 }
  0x9c   : > { %v872_v50 = vpop.permute.xlu1 %871  ;;  %2492 = vrot.lane.b32.xlu1 %v3327_v12, %s3288_s26  ;;  %2494 = vrot.lane.b32.xlu0 %v3359_v20, %s3288_s26 }
  0x9d   : > { %v884_v51 = vsel %vm879_vm4, %v3501_v49, %v872_v50 }
  0x9e   : > { %v3513_v52 = vpop.permute.xlu0 %873  ;;  %v904_v54 = vsel %vm395_vm0, %v884_v51, 0 }
  0x9f   : > { %v885_v53 = vsel %vm879_vm4, %v872_v50, %v3513_v52 }
  0xa0   : > { %2922 = vmatmul.mubr.msk.bf16.vlgmr.msra.gmra.mrb[8].mxu1 %vm391_vm1, %v3462_v32  ;;  %2939 = vmatprep.subr.msk.bf16.mxu0 %vm395_vm0, %v885_v53  ;;  %v379_v55 = vpop.permute.xlu1 %378 }
  0xa1   : > { %v389_v56 = vsel %vm382_vm3, %v377_v46, %v379_v55  ;;  %1001 = vmatpush1.bf16.msra.mxu0 %v904_v54  ;;  %578 = vmatprep.mubr.bf16.mxu1 %v3278_v3 }
  0xa2   : > { %v381_v57 = vpop.permute.xlu0 %380  ;;  %3030 = vmatprep.subr.bf16.mxu0 %v3280_v18  ;;  %2496 = vrot.lane.b32.xlu1 %v3323_v11, %s3288_s26  ;;  %v415_v59 = vsel %vm395_vm0, %v389_v56, 0 }
  0xa3   : > { %v390_v58 = vsel %vm382_vm3, %v379_v55, %v381_v57  ;;  %2498 = vrot.lane.b32.xlu0 %v3335_v14, %s3288_s26  ;;  %v421_v63 = vsel %vm395_vm0, %v381_v57, 0 }
  0xa4   : > { %2923 = vmatprep.subr.msk.bf16.mxu1 %vm395_vm0, %v390_v58  ;;  %2940 = vmatmul.mubr.msk.bf16.vlgmr.msra.gmra.mrb[0].mxu0 %vm391_vm1, %v3492_v45  ;;  %v3533_v60 = vpop.permute.xlu1 %877 }
  0xa5   : > { %547 = vmatpush1.bf16.msra.mxu1 %v415_v59  ;;  %v916_v61 = vsel %vm395_vm0, %v3533_v60, 0  ;;  %3032 = vmatprep.mubr.msk.bf16.mxu0 %vm3282_vm2, %v3280_v18 }
  0xa6   : > { %v1132_v62 = vpop.permute.xlu0 %1131  ;;  %3018 = vmatprep.subr.bf16.mxu1 %v3280_v18  ;;  %3031 = vmatpush3.bf16.msra.mxu0 %v916_v61 }
  0xa7   : > { %2500 = vrot.lane.b32.xlu1 %v3373_v22, %s3288_s26  ;;  %2502 = vrot.lane.b32.xlu0 %v3388_v23, %s3288_s26 }
  0xa8   : > { %2924 = vmatmul.mubr.msk.bf16.vlgmr.msra.gmra.mrb[12].mxu1 %vm391_vm1, %v3462_v32  ;;  %v1134_v1 = vpop.permute.xlu1 %1133 }
  0xa9   : > { %3019 = vmatpush3.bf16.msra.mxu1 %v421_v63  ;;  %v1150_v2 = vsel %vm1149_vm5, %v1132_v62, %v1134_v1  ;;  %3020 = vmatprep.mubr.msk.bf16.mxu1 %vm3282_vm2, %v3280_v18 }
  0xaa   : > { %v3550_v4 = vpop.permute.xlu0 %1135  ;;  %v1162_v5 = vsel %vm395_vm0, %v1150_v2, 0  ;;  %2926 = vmatprep.subr.msk.bf16.mxu1 %vm395_vm0, %v3331_v13 }
  0xab   : > { %v1151_v6 = vsel %vm1149_vm5, %v1134_v1, %v3550_v4  ;;  %2504 = vrot.lane.b32.xlu1 %v3348_v17, %s3288_s26  ;;  %2506 = vrot.lane.b32.xlu0 %v3437_v24, %s3288_s26  ;;  %v637_v24 = vsel %vm395_vm0, %v3327_v12, 0 }
  0xac   : > { %3033 = vmatmul.mubr.msk.bf16.vlgmr.msra.gmra.mrb[4].mxu0 %vm391_vm1, %v3492_v45  ;;  %2944 = vmatprep.subr.msk.bf16.mxu0 %vm395_vm0, %v1151_v6  ;;  %v3564_v7 = vpop.permute.xlu1 %1139 }
  0xad   : > { %1189 = vmatpush1.bf16.msra.mxu0 %v1162_v5  ;;  %1220 = vmatprep.mubr.bf16.mxu0 %v3278_v3 }
  0xae   : > { %v1142_v8 = vpop.permute.xlu0 %1141 }
  0xaf   : > { %v1154_v11 = vsel %vm1149_vm5, %v3564_v7, %v1142_v8 }
  0xb0   : > { %3021 = vmatmul.mubr.msk.bf16.vlgmr.msra.gmra.mrb[16].mxu1 %vm391_vm1, %v3462_v32  ;;  %v3573_v13 = vpop.permute.xlu1 %1143  ;;  %v1174_v9 = vsel %vm395_vm0, %v1154_v11, 0 }
  0xb1   : > { %v1155_v14 = vsel %vm1149_vm5, %v1142_v8, %v3573_v13  ;;  %658 = vmatpush1.bf16.msra.mxu1 %v631_v10  ;;  %689 = vmatprep.mubr.bf16.mxu1 %v3278_v3 }
  0xb2   : > { %v3584_v17 = vpop.permute.xlu0 %1147  ;;  %2948 = vmatprep.subr.msk.bf16.mxu0 %vm395_vm0, %v1155_v14  ;;  %2928 = vmatprep.subr.msk.bf16.mxu1 %vm395_vm0, %v3359_v20 }
  0xb3   : > { %v1186_v20 = vsel %vm395_vm0, %v3584_v17, 0 }
  0xb4   : > { %2945 = vmatmul.mubr.msk.bf16.vlgmr.msra.gmra.mrb[8].mxu0 %vm391_vm1, %v3580_v15  ;;  %v1402_v19 = vpop.permute.xlu1 %1401 }
  0xb5   : > { %1271 = vmatpush1.bf16.msra.mxu0 %v1174_v9  ;;  %1302 = vmatprep.mubr.bf16.mxu0 %v3278_v3 }
  0xb6   : > { %v1404_v21 = vpop.permute.xlu0 %1403  ;;  %3036 = vmatprep.subr.bf16.mxu0 %v3280_v18 }
  0xb8   : > { %2927 = vmatmul.mubr.msk.bf16.vlgmr.msra.gmra.mrb[0].mxu1 %vm391_vm1, %v3346_v16  ;;  %v3597_v25 = vpop.permute.xlu1 %1405 }
  0xb9   : > { %699 = vmatpush1.bf16.msra.mxu1 %v637_v24  ;;  %730 = vmatprep.mubr.bf16.mxu1 %v3278_v3  ;;  %v1421_v12 = vsel %vm1419_vm6, %v1404_v21, %v3597_v25 }
  0xba   : > { %v868_v26 = vpop.permute.xlu0 %867  ;;  %2932 = vmatprep.subr.msk.bf16.mxu1 %vm395_vm0, %v3388_v23  ;;  %v1420_v23 = vsel %vm1419_vm6, %v1402_v19, %v1404_v21 }
  0xbb   : > { %v883_v31 = vsel %vm879_vm4, %v868_v26, %v3501_v49  ;;  %v1432_v32 = vsel %vm395_vm0, %v1420_v23, 0  ;;  %v882_v35 = vsel %vm879_vm4, %v3478_v40, %v868_v26  ;;  %v3645_v40 = vld [vmem:[%s4077_s1 + $0x10] sm:$0xf] }
  0xbc   : > { %2949 = vmatmul.mubr.msk.bf16.vlgmr.msra.gmra.mrb[0].mxu0 %vm391_vm1, %v3580_v15  ;;  %v3608_v27 = vpop.permute.xlu1 %1409  ;;  %v898_v38 = vsel %vm395_vm0, %v882_v35, 0 }
  0xbd   : > { %3037 = vmatpush3.bf16.msra.mxu0 %v1186_v20  ;;  %3038 = vmatprep.mubr.msk.bf16.mxu0 %vm3282_vm2, %v3280_v18 }
  0xbe   : > { %v1412_v28 = vpop.permute.xlu0 %1411  ;;  %2953 = vmatprep.subr.msk.bf16.mxu0 %vm395_vm0, %v1421_v12 }
  0xbf   : > { %v1424_v37 = vsel %vm1419_vm6, %v3608_v27, %v1412_v28 }
  0xc0   : > { %2929 = vmatmul.mubr.msk.bf16.vlgmr.msra.gmra.mrb[4].mxu1 %vm391_vm1, %v3346_v16  ;;  %v3618_v30 = vpop.permute.xlu1 %1413  ;;  %v1444_v42 = vsel %vm395_vm0, %v1424_v37, 0 }
  0xc1   : > { %781 = vmatpush1.bf16.msra.mxu1 %v649_v29  ;;  %812 = vmatprep.mubr.bf16.mxu1 %v3278_v3  ;;  %v1425_v33 = vsel %vm1419_vm6, %v1412_v28, %v3618_v30 }
  0xc2   : > { %2937 = vmatprep.subr.msk.bf16.mxu1 %vm395_vm0, %v883_v31  ;;  %v876_v22 = vpop.permute.xlu0 %875 }
  0xc3   : > { %v887_v41 = vsel %vm879_vm4, %v876_v22, %v3533_v60  ;;  %v886_v44 = vsel %vm879_vm4, %v3513_v52, %v876_v22 }
  0xc4   : > { %3039 = vmatmul.mubr.msk.bf16.vlgmr.msra.gmra.mrb[4].mxu0 %vm391_vm1, %v3580_v15  ;;  %v3629_v34 = vpop.permute.xlu1 %1417  ;;  %v910_v47 = vsel %vm395_vm0, %v886_v44, 0 }
  0xc5   : > { %1459 = vmatpush1.bf16.msra.mxu0 %v1432_v32  ;;  %1490 = vmatprep.mubr.bf16.mxu0 %v3278_v3  ;;  %v1456_v50 = vsel %vm395_vm0, %v3629_v34, 0 }
  0xc6   : > { %v1138_v36 = vpop.permute.xlu0 %1137  ;;  %2957 = vmatprep.subr.msk.bf16.mxu0 %vm395_vm0, %v1425_v33 }
  0xc7   : > { %v1153_v49 = vsel %vm1149_vm5, %v1138_v36, %v3564_v7  ;;  %v1152_v54 = vsel %vm1149_vm5, %v3550_v4, %v1138_v36  ;;  %v3711_v7 = vld [vmem:[%s4077_s1 + $0x14] sm:$0xf] }
  0xc8   : > { %2933 = vmatmul.mubr.msk.bf16.vlgmr.msra.gmra.mrb[12].mxu1 %vm391_vm1, %v3346_v16  ;;  %v1672_v39 = vpop.permute.xlu1 %1671  ;;  %v1168_v57 = vsel %vm395_vm0, %v1152_v54, 0 }
  0xc9   : > { %960 = vmatpush1.bf16.msra.mxu1 %v898_v38  ;;  %991 = vmatprep.mubr.bf16.mxu1 %v3278_v3  ;;  %v3773_v38 = vld [vmem:[%s4077_s1 + $0x18] sm:$0xf] }
  0xca   : > { %2941 = vmatprep.subr.msk.bf16.mxu1 %vm395_vm0, %v887_v41  ;;  %v1674_v43 = vpop.permute.xlu0 %1673 }
  0xcb   : > { %v1690_v56 = vsel %vm1689_vm7, %v1672_v39, %v1674_v43 }
  0xcc   : > { %2954 = vmatmul.mubr.msk.bf16.vlgmr.msra.gmra.mrb[8].mxu0 %vm391_vm1, %v3645_v40  ;;  %v3652_v16 = vpop.permute.xlu1 %1675  ;;  %v1702_v60 = vsel %vm395_vm0, %v1690_v56, 0 }
  0xcd   : > { %1541 = vmatpush1.bf16.msra.mxu0 %v1444_v42  ;;  %1572 = vmatprep.mubr.bf16.mxu0 %v3278_v3  ;;  %v1691_v52 = vsel %vm1689_vm7, %v1674_v43, %v3652_v16 }
  0xce   : > { %v1146_v46 = vpop.permute.xlu0 %1145  ;;  %3042 = vmatprep.subr.bf16.mxu0 %v3280_v18 }
  0xcf   : > { %v1157_v59 = vsel %vm1149_vm5, %v1146_v46, %v3584_v17  ;;  %v1156_v63 = vsel %vm1149_vm5, %v3573_v13, %v1146_v46 }
  0xd0   : > { %2938 = vmatmul.mubr.msk.bf16.vlgmr.msra.gmra.mrb[4].mxu1 %vm391_vm1, %v3492_v45  ;;  %v3661_v48 = vpop.permute.xlu1 %1679  ;;  %v1180_v4 = vsel %vm395_vm0, %v1156_v63, 0  ;;  %v315_v63 = vld [vmem:[%s4077_s1 + $0x1c] sm:$0xf] }
  0xd1   : > { %1042 = vmatpush1.bf16.msra.mxu1 %v910_v47  ;;  %1073 = vmatprep.mubr.bf16.mxu1 %v3278_v3 }
  0xd2   : > { %2946 = vmatprep.subr.msk.bf16.mxu1 %vm395_vm0, %v1153_v49  ;;  %v1682_v51 = vpop.permute.xlu0 %1681 }
  0xd3   : > { %v1694_v2 = vsel %vm1689_vm7, %v3661_v48, %v1682_v51 }
  0xd4   : > { %2958 = vmatmul.mubr.msk.bf16.vlgmr.msra.gmra.mrb[0].mxu0 %vm391_vm1, %v3645_v40  ;;  %v3673_v53 = vpop.permute.xlu1 %1683  ;;  %v1714_v8 = vsel %vm395_vm0, %v1694_v2, 0 }
  0xd5   : > { %3043 = vmatpush3.bf16.msra.mxu0 %v1456_v50  ;;  %3044 = vmatprep.mubr.msk.bf16.mxu0 %vm3282_vm2, %v3280_v18  ;;  %v1695_v62 = vsel %vm1689_vm7, %v1682_v51, %v3673_v53 }
  0xd6   : > { %v1408_v55 = vpop.permute.xlu0 %1407  ;;  %2962 = vmatprep.subr.msk.bf16.mxu0 %vm395_vm0, %v1691_v52 }
  0xd7   : > { %v1423_v6 = vsel %vm1419_vm6, %v1408_v55, %v3608_v27  ;;  %v1422_v13 = vsel %vm1419_vm6, %v3597_v25, %v1408_v55 }
  0xd8   : > { %2942 = vmatmul.mubr.msk.bf16.vlgmr.msra.gmra.mrb[12].mxu1 %vm391_vm1, %v3492_v45  ;;  %v3684_v58 = vpop.permute.xlu1 %1687  ;;  %v1438_v9 = vsel %vm395_vm0, %v1422_v13, 0 }
  0xd9   : > { %1230 = vmatpush1.bf16.msra.mxu1 %v1168_v57  ;;  %1261 = vmatprep.mubr.bf16.mxu1 %v3278_v3  ;;  %v1726_v21 = vsel %vm395_vm0, %v3684_v58, 0 }
  0xda   : > { %2950 = vmatprep.subr.msk.bf16.mxu1 %vm395_vm0, %v1157_v59  ;;  %v1416_v61 = vpop.permute.xlu0 %1415 }
  0xdb   : > { %v1427_v19 = vsel %vm1419_vm6, %v1416_v61, %v3629_v34  ;;  %v1426_v20 = vsel %vm1419_vm6, %v3618_v30, %v1416_v61 }
  0xdc   : > { %3045 = vmatmul.mubr.msk.bf16.vlgmr.msra.gmra.mrb[4].mxu0 %vm391_vm1, %v3645_v40  ;;  %v1943_v45 = vpop.permute.xlu1 %1942  ;;  %v1450_v27 = vsel %vm395_vm0, %v1426_v20, 0 }
  0xdd   : > { %1729 = vmatpush1.bf16.msra.mxu0 %v1702_v60  ;;  %1760 = vmatprep.mubr.bf16.mxu0 %v3278_v3 }
  0xde   : > { %v1945_v1 = vpop.permute.xlu0 %1944  ;;  %2966 = vmatprep.subr.msk.bf16.mxu0 %vm395_vm0, %v1695_v62 }
  0xdf   : > { %v1963_v12 = vsel %vm1962_vm8, %v1943_v45, %v1945_v1 }
  0xe0   : > { %2947 = vmatmul.mubr.msk.bf16.vlgmr.msra.gmra.mrb[4].mxu1 %vm391_vm1, %v3580_v15  ;;  %v3704_v5 = vpop.permute.xlu1 %1946  ;;  %v1976_v23 = vsel %vm395_vm0, %v1963_v12, 0 }
  0xe1   : > { %1312 = vmatpush1.bf16.msra.mxu1 %v1180_v4  ;;  %1343 = vmatprep.mubr.bf16.mxu1 %v3278_v3  ;;  %v1964_v25 = vsel %vm1962_vm8, %v1945_v1, %v3704_v5 }
  0xe2   : > { %2955 = vmatprep.subr.msk.bf16.mxu1 %vm395_vm0, %v1423_v6  ;;  %v1678_v10 = vpop.permute.xlu0 %1677 }
  0xe3   : > { %v1693_v29 = vsel %vm1689_vm7, %v1678_v10, %v3661_v48  ;;  %v1692_v22 = vsel %vm1689_vm7, %v3652_v16, %v1678_v10 }
  0xe4   : > { %2963 = vmatmul.mubr.msk.bf16.vlgmr.msra.gmra.mrb[8].mxu0 %vm391_vm1, %v3711_v7  ;;  %v3718_v11 = vpop.permute.xlu1 %1950  ;;  %v1708_v35 = vsel %vm395_vm0, %v1692_v22, 0 }
  0xe5   : > { %1811 = vmatpush1.bf16.msra.mxu0 %v1714_v8  ;;  %1842 = vmatprep.mubr.bf16.mxu0 %v3278_v3 }
  0xe6   : > { %v1953_v14 = vpop.permute.xlu0 %1952  ;;  %3048 = vmatprep.subr.bf16.mxu0 %v3280_v18 }
  0xe7   : > { %v1967_v34 = vsel %vm1962_vm8, %v3718_v11, %v1953_v14 }
  0xe8   : > { %2951 = vmatmul.mubr.msk.bf16.vlgmr.msra.gmra.mrb[12].mxu1 %vm391_vm1, %v3580_v15  ;;  %v3727_v17 = vpop.permute.xlu1 %1954  ;;  %v1988_v39 = vsel %vm395_vm0, %v1967_v34, 0 }
  0xe9   : > { %1500 = vmatpush1.bf16.msra.mxu1 %v1438_v9  ;;  %1531 = vmatprep.mubr.bf16.mxu1 %v3278_v3  ;;  %v1968_v31 = vsel %vm1962_vm8, %v1953_v14, %v3727_v17 }
  0xea   : > { %2959 = vmatprep.subr.msk.bf16.mxu1 %vm395_vm0, %v1427_v19  ;;  %v1686_v24 = vpop.permute.xlu0 %1685 }
  0xeb   : > { %v1697_v37 = vsel %vm1689_vm7, %v1686_v24, %v3684_v58  ;;  %v1696_v42 = vsel %vm1689_vm7, %v3673_v53, %v1686_v24 }
  0xec   : > { %2967 = vmatmul.mubr.msk.bf16.vlgmr.msra.gmra.mrb[0].mxu0 %vm391_vm1, %v3711_v7  ;;  %v1959_v15 = vpop.permute.xlu1 %1958  ;;  %v1720_v16 = vsel %vm395_vm0, %v1696_v42, 0 }
  0xed   : > { %3049 = vmatpush3.bf16.msra.mxu0 %v1726_v21  ;;  %3050 = vmatprep.mubr.msk.bf16.mxu0 %vm3282_vm2, %v3280_v18 }
  0xee   : > { %2971 = vmatprep.subr.msk.bf16.mxu0 %vm395_vm0, %v1964_v25  ;;  %v1961_v26 = vpop.permute.xlu0 %1960 }
  0xef   : > { %v1971_v43 = vsel %vm1962_vm8, %v1959_v15, %v1961_v26 }
  0xf0   : > { %2956 = vmatmul.mubr.msk.bf16.vlgmr.msra.gmra.mrb[4].mxu1 %vm391_vm1, %v3645_v40  ;;  %v1949_v28 = vpop.permute.xlu1 %1948  ;;  %v2000_v46 = vsel %vm395_vm0, %v1971_v43, 0 }
  0xf1   : > { %1582 = vmatpush1.bf16.msra.mxu1 %v1450_v27  ;;  %1613 = vmatprep.mubr.bf16.mxu1 %v3278_v3  ;;  %v1966_v44 = vsel %vm1962_vm8, %v1949_v28, %v3718_v11  ;;  %v1965_v50 = vsel %vm1962_vm8, %v3704_v5, %v1949_v28 }
  0xf2   : > { %2964 = vmatprep.subr.msk.bf16.mxu1 %vm395_vm0, %v1693_v29  ;;  %v2216_v30 = vpop.permute.xlu0 %2215  ;;  %v1982_v54 = vsel %vm395_vm0, %v1965_v50, 0 }
  0xf4   : > { %3051 = vmatmul.mubr.msk.bf16.vlgmr.msra.gmra.mrb[4].mxu0 %vm391_vm1, %v3711_v7  ;;  %v2218_v32 = vpop.permute.xlu1 %2217 }
  0xf5   : > { %2003 = vmatpush1.bf16.msra.mxu0 %v1976_v23  ;;  %2034 = vmatprep.mubr.bf16.mxu0 %v3278_v3  ;;  %v2236_v53 = vsel %vm2235_vm9, %v2216_v30, %v2218_v32  ;;  %v316_v30 = vld [vmem:[%s4077_s1 + $0x20] sm:$0xf] }
  0xf6   : > { %2975 = vmatprep.subr.msk.bf16.mxu0 %vm395_vm0, %v1968_v31  ;;  %v3761_v33 = vpop.permute.xlu0 %2219  ;;  %v2249_v56 = vsel %vm395_vm0, %v2236_v53, 0 }
  0xf7   : > { %v2237_v49 = vsel %vm2235_vm9, %v2218_v32, %v3761_v33 }
  0xf8   : > { %2960 = vmatmul.mubr.msk.bf16.vlgmr.msra.gmra.mrb[12].mxu1 %vm391_vm1, %v3645_v40  ;;  %v1957_v36 = vpop.permute.xlu1 %1956 }
  0xf9   : > { %1770 = vmatpush1.bf16.msra.mxu1 %v1708_v35  ;;  %1801 = vmatprep.mubr.bf16.mxu1 %v3278_v3  ;;  %v1970_v52 = vsel %vm1962_vm8, %v1957_v36, %v1959_v15  ;;  %v1969_v59 = vsel %vm1962_vm8, %v3727_v17, %v1957_v36 }
  0xfa   : > { %2968 = vmatprep.subr.msk.bf16.mxu1 %vm395_vm0, %v1697_v37  ;;  %v2224_v41 = vpop.permute.xlu0 %2223  ;;  %v1994_v45 = vsel %vm395_vm0, %v1969_v59, 0 }
  0xfc   : > { %2972 = vmatmul.mubr.msk.bf16.vlgmr.msra.gmra.mrb[8].mxu0 %vm391_vm1, %v3773_v38  ;;  %v2226_v40 = vpop.permute.xlu1 %2225 }
  0xfd   : > { %2085 = vmatpush1.bf16.msra.mxu0 %v1988_v39  ;;  %2116 = vmatprep.mubr.bf16.mxu0 %v3278_v3  ;;  %v2240_v61 = vsel %vm2235_vm9, %v2224_v41, %v2226_v40 }
  0xfe   : > { %3054 = vmatprep.subr.bf16.mxu0 %v3280_v18  ;;  %v2228_v47 = vpop.permute.xlu0 %2227  ;;  %v2261_v1 = vsel %vm395_vm0, %v2240_v61, 0 }
  0xff   : > { %v2241_v57 = vsel %vm2235_vm9, %v2226_v40, %v2228_v47 }
 0x100   : > { %2965 = vmatmul.mubr.msk.bf16.vlgmr.msra.gmra.mrb[4].mxu1 %vm391_vm1, %v3711_v7  ;;  %v2222_v48 = vpop.permute.xlu1 %2221 }
 0x101   : > { %1852 = vmatpush1.bf16.msra.mxu1 %v1720_v16  ;;  %1883 = vmatprep.mubr.bf16.mxu1 %v3278_v3  ;;  %v2239_v62 = vsel %vm2235_vm9, %v2222_v48, %v2224_v41  ;;  %v2238_v5 = vsel %vm2235_vm9, %v3761_v33, %v2222_v48 }
 0x102   : > { %2973 = vmatprep.subr.msk.bf16.mxu1 %vm395_vm0, %v1966_v44  ;;  %v2232_v55 = vpop.permute.xlu0 %2231  ;;  %v2255_v8 = vsel %vm395_vm0, %v2238_v5, 0 }
 0x104   : > { %2976 = vmatmul.mubr.msk.bf16.vlgmr.msra.gmra.mrb[0].mxu0 %vm391_vm1, %v3773_v38  ;;  %v2234_v51 = vpop.permute.xlu1 %2233 }
 0x105   : > { %3055 = vmatpush3.bf16.msra.mxu0 %v2000_v46  ;;  %3056 = vmatprep.mubr.msk.bf16.mxu0 %vm3282_vm2, %v3280_v18  ;;  %v146_v46 = vand.u32 127, %v145_v0 }
 0x106   : > { %2980 = vmatprep.subr.msk.bf16.mxu0 %vm395_vm0, %v2237_v49  ;;  %v2230_v60 = vpop.permute.xlu0 %2229 }
 0x107   : > { %v2243_v6 = vsel %vm2235_vm9, %v2230_v60, %v2232_v55  ;;  %v2242_v9 = vsel %vm2235_vm9, %v2228_v47, %v2230_v60  ;;  %v147_v47 = vadd.s32 128, %v146_v46  ;;  %v148_v48 = vadd.s32 256, %v146_v46 }
 0x108   : > { %2969 = vmatmul.mubr.msk.bf16.vlgmr.msra.gmra.mrb[12].mxu1 %vm391_vm1, %v3711_v7  ;;  %v2489_v58 = vpop.permute.xlu1 %2488  ;;  %v2244_v7 = vsel %vm2235_vm9, %v2232_v55, %v2234_v51  ;;  %v2267_v25 = vsel %vm395_vm0, %v2242_v9, 0  ;;  %v3894_v49 = vmul.u32.u64.low 4042322161, %v146_v46  ;;  %v3895_v50 = vmul.u32.u64.high 4042322161, %v146_v46, %v3894_v49 }
 0x109   : > { %2044 = vmatpush1.bf16.msra.mxu1 %v1982_v54  ;;  %2075 = vmatprep.mubr.bf16.mxu1 %v3278_v3  ;;  %v2273_v13 = vsel %vm395_vm0, %v2244_v7, 0  ;;  %v149_v51 = vadd.s32 384, %v146_v46  ;;  %v3900_v54 = vmul.u32.u64.low 4042322161, %v148_v48  ;;  %v3901_v55 = vmul.u32.u64.high 4042322161, %v148_v48, %v3900_v54 }
 0x10a   : > { %2977 = vmatprep.subr.msk.bf16.mxu1 %vm395_vm0, %v1970_v52  ;;  %v2491_v2 = vpop.permute.xlu0 %2490  ;;  %v3897_v52 = vmul.u32.u64.low 4042322161, %v147_v47  ;;  %v3898_v53 = vmul.u32.u64.high 4042322161, %v147_v47, %v3897_v52  ;;  %v151_v59 = vadd.s32 640, %v146_v46  ;;  %v152_v60 = vadd.s32 768, %v146_v46 }
 0x10b   : > { %v2509_v21 = vsel %vm2508_vm10, %v2489_v58, %v2491_v2  ;;  %v150_v58 = vadd.s32 512, %v146_v46  ;;  %v161_v0 = vshrl.u32 %v3895_v50, 5 }
 0x10c   : > { %3057 = vmatmul.mubr.msk.bf16.vlgmr.msra.gmra.mrb[4].mxu0 %vm391_vm1, %v3773_v38  ;;  %v2522_v15 = vsel %vm395_vm0, %v2509_v21, 0 }
 0x10d   : > { %2276 = vmatpush1.bf16.msra.mxu0 %v2249_v56  ;;  %2307 = vmatprep.mubr.bf16.mxu0 %v3278_v3  ;;  %v162_v7 = vmul.u32 34, %v161_v0 }
 0x10e   : > { %2984 = vmatprep.subr.msk.bf16.mxu0 %vm395_vm0, %v2241_v57  ;;  %v2493_v4 = vpop.permute.xlu1 %2492  ;;  %v2495_v10 = vpop.permute.xlu0 %2494  ;;  %v3903_v56 = vmul.u32.u64.low 4042322161, %v149_v51  ;;  %v3904_v57 = vmul.u32.u64.high 4042322161, %v149_v51, %v3903_v56 }
 0x10f   : > { %v2510_v14 = vsel %vm2508_vm10, %v2491_v2, %v2493_v4  ;;  %v2511_v20 = vsel %vm2508_vm10, %v2493_v4, %v2495_v10  ;;  %v183_v4 = vshrl.u32 %v3901_v55, 5 }
 0x110   : > { %2974 = vmatmul.mubr.msk.bf16.vlgmr.msra.gmra.mrb[4].mxu1 %vm391_vm1, %v3773_v38  ;;  %v2528_v28 = vsel %vm395_vm0, %v2511_v20, 0 }
 0x111   : > { %2126 = vmatpush1.bf16.msra.mxu1 %v1994_v45  ;;  %2157 = vmatprep.mubr.bf16.mxu1 %v3278_v3  ;;  %v153_v45 = vadd.s32 896, %v146_v46  ;;  %v184_v9 = vmul.u32 34, %v183_v4 }
 0x112   : > { %2982 = vmatprep.subr.msk.bf16.mxu1 %vm395_vm0, %v2239_v62  ;;  %v3907_v61 = vmul.u32.u64.low 4042322161, %v150_v58  ;;  %v3908_v62 = vmul.u32.u64.high 4042322161, %v150_v58, %v3907_v61 }
 0x114   : > { %2981 = vmatmul.mubr.msk.bf16.vlgmr.msra.gmra.mrb[8].mxu0 %vm391_vm1, %v315_v63  ;;  %v2497_v11 = vpop.permute.xlu1 %2496  ;;  %v205_v21 = vshrl.u32 %v3908_v62, 5 }
 0x115   : > { %2358 = vmatpush1.bf16.msra.mxu0 %v2261_v1  ;;  %2389 = vmatprep.mubr.bf16.mxu0 %v3278_v3  ;;  %v2499_v17 = vpop.permute.xlu0 %2498  ;;  %v2512_v24 = vsel %vm2508_vm10, %v2495_v10, %v2497_v11  ;;  %v3911_v1 = vmul.u32.u64.low 4042322161, %v151_v59  ;;  %v3912_v2 = vmul.u32.u64.high 4042322161, %v151_v59, %v3911_v1 }
 0x116   : > { %3060 = vmatprep.subr.bf16.mxu0 %v3280_v18  ;;  %v2513_v29 = vsel %vm2508_vm10, %v2497_v11, %v2499_v17  ;;  %v3919_v10 = vmul.u32.u64.low 4042322161, %v153_v45  ;;  %v3920_v11 = vmul.u32.u64.high 4042322161, %v153_v45, %v3919_v10 }
 0x117   : > { %v2534_v31 = vsel %vm395_vm0, %v2513_v29, 0 }
 0x118   : > { %2978 = vmatmul.mubr.msk.bf16.vlgmr.msra.gmra.mrb[12].mxu1 %vm391_vm1, %v3773_v38  ;;  %v238_v29 = vshrl.u32 %v3920_v11, 5 }
 0x119   : > { %2317 = vmatpush1.bf16.msra.mxu1 %v2255_v8  ;;  %2348 = vmatprep.mubr.bf16.mxu1 %v3278_v3  ;;  %v2501_v19 = vpop.permute.xlu1 %2500  ;;  %v2503_v12 = vpop.permute.xlu0 %2502  ;;  %v194_v8 = vshrl.u32 %v3904_v57, 5 }
 0x11a   : > { %2986 = vmatprep.subr.msk.bf16.mxu1 %vm395_vm0, %v2243_v6  ;;  %v2514_v26 = vsel %vm2508_vm10, %v2499_v17, %v2501_v19  ;;  %v2515_v32 = vsel %vm2508_vm10, %v2501_v19, %v2503_v12  ;;  %v3915_v5 = vmul.u32.u64.low 4042322161, %v152_v60  ;;  %v3916_v6 = vmul.u32.u64.high 4042322161, %v152_v60, %v3915_v5 }
 0x11b   : > { %v2540_v33 = vsel %vm395_vm0, %v2515_v32, 0  ;;  %v163_v17 = vsub.s32 %v146_v46, %v162_v7  ;;  %v195_v19 = vmul.u32 34, %v194_v8 }
 0x11c   : > { %2985 = vmatmul.mubr.msk.bf16.vlgmr.msra.gmra.mrb[0].mxu0 %vm391_vm1, %v315_v63 }
 0x11d   : > { %3061 = vmatpush3.bf16.msra.mxu0 %v2273_v13  ;;  %3062 = vmatprep.mubr.msk.bf16.mxu0 %vm3282_vm2, %v3280_v18  ;;  %v2505_v27 = vpop.permute.xlu1 %2504  ;;  %v2507_v22 = vpop.permute.xlu0 %2506  ;;  %vm254_vm11 = vcmp.ne.s32.totalorder %v163_v17, 0  ;;  %vm263_vm12 = vcmp.lt.s32.totalorder %v163_v17, 0 }
 0x11e   : > { %2989 = vmatprep.subr.msk.bf16.mxu0 %vm395_vm0, %v2510_v14  ;;  %v2516_v23 = vsel %vm2508_vm10, %v2503_v12, %v2505_v27  ;;  %v2517_v34 = vsel %vm2508_vm10, %v2505_v27, %v2507_v22  ;;  %v3922_v14 = vadd.s32 1024, %v146_v46  ;;  %v227_v12 = vshrl.u32 %v3916_v6, 5 }
 0x11f   : > { %v2546_v35 = vsel %vm395_vm0, %v2517_v34, 0  ;;  %v196_v27 = vsub.s32 %v149_v51, %v195_v19 }
 0x120   : > { %2983 = vmatmul.mubr.msk.bf16.vlgmr.msra.gmra.mrb[4].mxu1 %vm391_vm1, %v315_v63 }
 0x121   : > { %2399 = vmatpush1.bf16.msra.mxu1 %v2267_v25  ;;  %2430 = vmatprep.mubr.bf16.mxu1 %v3278_v3  ;;  %v216_v25 = vshrl.u32 %v3912_v2, 5  ;;  %vm257_vm3 = vcmp.ne.s32.totalorder %v196_v27, 0  ;;  %vm266_vm4 = vcmp.lt.s32.totalorder %v196_v27, 0 }
 0x122   : > { %2991 = vmatprep.subr.msk.bf16.mxu1 %vm395_vm0, %v2512_v24  ;;  %vm3951_vm6 = vmand %vm266_vm4, %vm257_vm3 }
 0x124   : > { %3063 = vmatmul.mubr.msk.bf16.vlgmr.msra.gmra.mrb[4].mxu0 %vm391_vm1, %v315_v63 }
 0x125   : > { %2549 = vmatpush1.bf16.msra.mxu0 %v2522_v15  ;;  %2580 = vmatprep.mubr.bf16.mxu0 %v3278_v3  ;;  %v3927_v15 = vmul.u32.u64.low 4042322161, %v3922_v14  ;;  %v3928_v20 = vmul.u32.u64.high 4042322161, %v3922_v14, %v3927_v15 }
 0x126   : > { %2993 = vmatprep.subr.msk.bf16.mxu0 %vm395_vm0, %v2514_v26  ;;  %v185_v26 = vsub.s32 %v148_v48, %v184_v9 }
 0x128   : > { %2987 = vmatmul.mubr.msk.bf16.vlgmr.msra.gmra.mrb[12].mxu1 %vm391_vm1, %v315_v63  ;;  %v172_v63 = vshrl.u32 %v3898_v53, 5  ;;  %vm256_vm15 = vcmp.ne.s32.totalorder %v185_v26, 0 }
 0x129   : > { %2590 = vmatpush1.bf16.msra.mxu1 %v2528_v28  ;;  %2621 = vmatprep.mubr.bf16.mxu1 %v3278_v3  ;;  %v206_v28 = vmul.u32 34, %v205_v21 }
 0x12a   : > { %2995 = vmatprep.subr.msk.bf16.mxu1 %vm395_vm0, %v2516_v23  ;;  %v173_v13 = vmul.u32 34, %v172_v63  ;;  %v217_v23 = vmul.u32 34, %v216_v25  ;;  %vm265_vm0 = vcmp.lt.s32.totalorder %v185_v26, 0 }
 0x12b   : > { %vm3940_vm5 = vmand %vm265_vm0, %vm256_vm15 }
 0x12c   : > { %2990 = vmatmul.mubr.msk.bf16.vlgmr.msra.gmra.mrb[8].mxu0 %vm391_vm1, %v316_v30  ;;  %v174_v24 = vsub.s32 %v147_v47, %v173_v13 }
 0x12d   : > { %2631 = vmatpush1.bf16.msra.mxu0 %v2534_v31  ;;  %2662 = vmatprep.mubr.bf16.mxu0 %v3278_v3  ;;  %v228_v31 = vmul.u32 34, %v227_v12 }
 0x12e   : > { %3066 = vmatprep.subr.bf16.mxu0 %v3280_v18  ;;  %vm255_vm13 = vcmp.ne.s32.totalorder %v174_v24, 0  ;;  %vm264_vm14 = vcmp.lt.s32.totalorder %v174_v24, 0  ;;  %v282_v22 = vadd.s32 34, %v174_v24 }
 0x130   : > { %2992 = vmatmul.mubr.msk.bf16.vlgmr.msra.gmra.mrb[4].mxu1 %vm391_vm1, %v316_v30 }
 0x131   : > { %2672 = vmatpush1.bf16.msra.mxu1 %v2540_v33  ;;  %2703 = vmatprep.mubr.bf16.mxu1 %v3278_v3  ;;  %v283_v33 = vadd.s32 34, %v185_v26 }
 0x133   : > { %v292_v48 = vsel %vm3940_vm5, %v283_v33, %v185_v26 }
 0x134   : > { %2994 = vmatmul.mubr.msk.bf16.vlgmr.msra.gmra.mrb[0].mxu0 %vm391_vm1, %v316_v30  ;;  %vm3974_vm15 = vcmp.lt.s32.totalorder %v292_v48, 32 }
 0x135   : > { %3067 = vmatpush3.bf16.msra.mxu0 %v2546_v35  ;;  %3068 = vmatprep.mubr.msk.bf16.mxu0 %vm3282_vm2, %v3280_v18  ;;  %vm3936_vm2 = vmand %vm264_vm14, %vm255_vm13  ;;  %v207_v35 = vsub.s32 %v150_v58, %v206_v28 }
 0x136   : > { %v291_v46 = vsel %vm3936_vm2, %v282_v22, %v174_v24 }
 0x137   : > { %vm258_vm7 = vcmp.ne.s32.totalorder %v207_v35, 0  ;;  %vm267_vm8 = vcmp.lt.s32.totalorder %v207_v35, 0  ;;  %v285_v54 = vadd.s32 34, %v207_v35  ;;  %vm3970_vm14 = vcmp.lt.s32.totalorder %v291_v46, 32 }
 0x138   : > { %2996 = vmatmul.mubr.msk.bf16.vlgmr.msra.gmra.mrb[12].mxu1 %vm391_vm1, %v316_v30  ;;  %vm3980_vm0 = vmand %vm267_vm8, %vm258_vm7 }
 0x139   : > { %v294_v6 = vsel %vm3980_vm0, %v285_v54, %v207_v35 }
 0x13c   : > { %3069 = vmatmul.mubr.msk.bf16.vlgmr.msra.gmra.mrb[4].mxu0 %vm391_vm1, %v316_v30  ;;  %v281_v30 = vadd.s32 34, %v163_v17  ;;  %vm3932_vm1 = vmand %vm263_vm12, %vm254_vm11 }
 0x173   : > { %v3883_v36 = vpop.f32.mrb[8].mxu1 }
 0x174   : > { %v3885_v37 = vpop.f32.mrb[9].mxu1 }
 0x175   : > { %v543_v38 = vpop.f32.mrb[10].mxu1 }
 0x176   : > { %v544_v39 = vpop.f32.mrb[11].mxu1  ;;  %v239_v38 = vmul.u32 34, %v238_v29 }
 0x178   : > { %v3957_v49 = vsub.s32 %v153_v45, %v239_v38 }
 0x17a   : > { %vm261_vm2 = vcmp.ne.s32.totalorder %v3957_v49, 0  ;;  %vm270_vm3 = vcmp.lt.s32.totalorder %v3957_v49, 0  ;;  %v288_v7 = vadd.s32 34, %v3957_v49 }
 0x183   : > { %v3887_v41 = vpop.f32.mrb[16].mxu1 }
 0x184   : > { %v3022_v3 = vpop.f32.mrb[17].mxu1 }
 0x185   : > { %v624_v40 = vpop.f32.mrb[18].mxu1  ;;  %v218_v3 = vsub.s32 %v151_v59, %v217_v23 }
 0x186   : > { %v3023_v42 = vpop.f32.mrb[19].mxu1  ;;  %v249_v40 = vshrl.u32 %v3928_v20, 5 }
 0x187   : > { %v290_v42 = vsel %vm3932_vm1, %v281_v30, %v163_v17  ;;  %vm259_vm10 = vcmp.ne.s32.totalorder %v218_v3, 0  ;;  %vm268_vm11 = vcmp.lt.s32.totalorder %v218_v3, 0 }
 0x188   : > { %vm3959_vm9 = vcmp.lt.s32.totalorder %v290_v42, 32  ;;  %v250_v51 = vmul.u32 34, %v249_v40  ;;  %vm3989_vm1 = vmand %vm268_vm11, %vm259_vm10 }
 0x18a   : > { %v251_v1 = vsub.s32 %v3922_v14, %v250_v51 }
 0x18b   : > { %v3889_v43 = vpop.f32.mrb[0].mxu1 }
 0x18c   : > { %v3891_v16 = vpop.f32.mrb[1].mxu1  ;;  %vm262_vm7 = vcmp.ne.s32.totalorder %v251_v1, 0  ;;  %vm271_vm8 = vcmp.lt.s32.totalorder %v251_v1, 0  ;;  %v289_v28 = vadd.s32 34, %v251_v1 }
 0x18d   : > { %v695_v18 = vpop.f32.mrb[2].mxu1 }
 0x18e   : > { %v696_v44 = vpop.f32.mrb[3].mxu1  ;;  %v284_v18 = vadd.s32 34, %v196_v27 }
 0x18f   : > { %v3947_v44 = vsub.s32 %v152_v60, %v228_v31  ;;  %v286_v60 = vadd.s32 34, %v218_v3 }
 0x190   : > { %v293_v53 = vsel %vm3951_vm6, %v284_v18, %v196_v27  ;;  %vm4027_vm6 = vmand %vm270_vm3, %vm261_vm2 }
 0x191   : > { %vm260_vm12 = vcmp.ne.s32.totalorder %v3947_v44, 0  ;;  %vm269_vm13 = vcmp.lt.s32.totalorder %v3947_v44, 0  ;;  %v287_v62 = vadd.s32 34, %v3947_v44  ;;  %vm302_vm4 = vcmp.lt.s32.totalorder %v293_v53, 32 }
 0x192   : > { %vm4003_vm5 = vmand %vm269_vm13, %vm260_vm12  ;;  %v295_v14 = vsel %vm3989_vm1, %v286_v60, %v218_v3  ;;  %v297_v27 = vsel %vm4027_vm6, %v288_v7, %v3957_v49 }
 0x193   : > { %v296_v24 = vsel %vm4003_vm5, %v287_v62, %v3947_v44  ;;  %vm4035_vm10 = vcmp.lt.s32.totalorder %v295_v14, 32  ;;  %vm4049_vm12 = vmand %vm271_vm8, %vm262_vm7  ;;  %vm306_vm13 = vcmp.lt.s32.totalorder %v297_v27, 32 }
 0x194   : > { %vm305_vm11 = vcmp.lt.s32.totalorder %v296_v24, 32  ;;  %v298_v46 = vsel %vm4049_vm12, %v289_v28, %v251_v1 }
 0x1ff   : > { %v2582_v52 = vpop.f32.mrb[8].mxu0 }
 0x200   : > { %v3968_v55 = vadd.f32 %v2582_v52, %v3889_v43  ;;  %v2584_v57 = vpop.f32.mrb[9].mxu0 }
 0x201   : > { %v3985_v0 = vadd.f32 %v2584_v57, %v3891_v16  ;;  %v2586_v43 = vpop.f32.mrb[10].mxu0 }
 0x202   : > { %v2761_v45 = vsel %vm3959_vm9, %v3968_v55, 0.0  ;;  %v2587_v63 = vpop.f32.mrb[11].mxu0  ;;  %vm303_vm9 = vcmp.lt.s32.totalorder %v294_v6, 32 }
 0x203   : > { %v2782_v2 = vmul.f32 %v2761_v45, %v2761_v45  ;;  %v2762_v4 = vsel %vm3970_vm14, %v3985_v0, 0.0  ;;  %v4011_v5 = vpop.f32.mrb[4].mxu1  ;;  %vm307_vm14 = vcmp.lt.s32.totalorder %v298_v46, 32 }
 0x204   : > { %v2770_v8 = vadd.f32 %v2762_v4, %v2761_v45  ;;  %v2783_v10 = vmul.f32 %v2762_v4, %v2762_v4  ;;  %v2763_v11 = vsel %vm3974_vm15, %v4011_v5, 0.0  ;;  %v4019_v13 = vpop.f32.mrb[5].mxu1  ;;  %vm2777_vm15 = vcmask 523264  }
 0x205   : > { %v2784_v17 = vmul.f32 %v2763_v11, %v2763_v11  ;;  %v2764_v19 = vsel %vm302_vm4, %v4019_v13, 0.0  ;;  %v2627_v21 = vpop.f32.mrb[6].mxu1 }
 0x206   : > { %v2791_v25 = vadd.f32 %v2783_v10, %v2782_v2  ;;  %v2771_v15 = vadd.f32 %v2770_v8, %v2763_v11  ;;  %v2628_v20 = vpop.f32.mrb[7].mxu1  ;;  %v2785_v30 = vmul.f32 %v2764_v19, %v2764_v19 }
 0x207   : > { %v2664_v26 = vpop.f32.mrb[0].mxu0 }
 0x208   : > { %v2792_v29 = vadd.f32 %v2791_v25, %v2784_v17  ;;  %v2772_v23 = vadd.f32 %v2771_v15, %v2764_v19  ;;  %v4043_v31 = vadd.f32 %v2664_v26, %v3883_v36  ;;  %v2666_v32 = vpop.f32.mrb[1].mxu0 }
 0x209   : > { %v4046_v22 = vadd.f32 %v2666_v32, %v3885_v37  ;;  %v2668_v33 = vpop.f32.mrb[2].mxu0 }
 0x20a   : > { %v2793_v35 = vadd.f32 %v2792_v29, %v2785_v30  ;;  %v2765_v38 = vsel %vm303_vm9, %v4043_v31, 0.0  ;;  %v2669_v39 = vpop.f32.mrb[3].mxu0 }
 0x20b   : > { %v2773_v3 = vadd.f32 %v2772_v23, %v2765_v38  ;;  %v2786_v40 = vmul.f32 %v2765_v38, %v2765_v38  ;;  %v2766_v36 = vsel %vm4035_vm10, %v4046_v22, 0.0  ;;  %v2705_v37 = vpop.f32.mrb[12].mxu1 }
 0x20c   : > { %v2787_v42 = vmul.f32 %v2766_v36, %v2766_v36  ;;  %v2767_v18 = vsel %vm305_vm11, %v2705_v37, 0.0  ;;  %v2707_v44 = vpop.f32.mrb[13].mxu1 }
 0x20d   : > { %v2794_v47 = vadd.f32 %v2793_v35, %v2786_v40  ;;  %v2774_v48 = vadd.f32 %v2773_v3, %v2766_v36  ;;  %v2768_v49 = vsel %vm306_vm13, %v2707_v44, 0.0  ;;  %v2709_v50 = vpop.f32.mrb[14].mxu1  ;;  %v2788_v54 = vmul.f32 %v2767_v18, %v2767_v18 }
 0x20e   : > { %v2710_v51 = vpop.f32.mrb[15].mxu1  ;;  %v2789_v43 = vmul.f32 %v2768_v49, %v2768_v49 }
 0x20f   : > { %v2795_v52 = vadd.f32 %v2794_v47, %v2787_v42  ;;  %v2775_v53 = vadd.f32 %v2774_v48, %v2767_v18  ;;  %v2746_v56 = vpop.f32.mrb[4].mxu0 }
 0x210   : > { %v3076_v57 = vadd.f32 %v2746_v56, %v3887_v41  ;;  %v3070_v58 = vpop.f32.mrb[5].mxu0 }
 0x211   : > { %v2796_v59 = vadd.f32 %v2795_v52, %v2788_v54  ;;  %v2776_v60 = vadd.f32 %v2775_v53, %v2768_v49  ;;  %v2749_v61 = vpop.f32.mrb[6].mxu0 }
 0x212   : > { %v2769_v62 = vsel %vm307_vm14, %v3076_v57, 0.0  ;;  %v3071_v45 = vpop.f32.mrb[7].mxu0 }
 0x213   : > { %v2790_v63 = vmul.f32 %v2769_v62, %v2769_v62  ;;  %v2778_v16 = vsel %vm2777_vm15, %v2769_v62, 0.0  ;;  %v2797_v1 = vadd.f32 %v2796_v59, %v2789_v43 }
 0x214   : > { %v2779_v2 = vadd.f32 %v2778_v16, %v2776_v60 }
 0x215   : > { %v2798_v4 = vsel %vm2777_vm15, %v2790_v63, 0.0 }
 0x216   : > { %2780 = vadd.xlane.f32.xlu1 %v2779_v2  ;;  %v2799_v6 = vadd.f32 %v2798_v4, %v2797_v1 }
 0x218   : > { %2800 = vadd.xlane.f32.xlu0 %v2799_v6 }
 0x2a3   : > { %v2781_v41 = vpop.xlane.xlu1 %2780 }
 0x2a4   : > { %v2802_v7 = vmul.f32 0.0009765625, %v2781_v41 }
 0x2a5   : > { %v2801_v8 = vpop.xlane.xlu0 %2800 }
 0x2a6   : > { %v2803_v10 = vmul.f32 0.0009765625, %v2801_v8  ;;  %v2804_v11 = vmul.f32 %v2802_v7, %v2802_v7  ;;  %v2807_v19 = vsub.f32 %v3968_v55, %v2802_v7  ;;  %v2808_v21 = vsub.f32 %v3985_v0, %v2802_v7 }
 0x2a7   : > { %v2809_v24 = vsub.f32 %v4011_v5, %v2802_v7  ;;  %v2810_v25 = vsub.f32 %v4019_v13, %v2802_v7  ;;  %v2811_v15 = vsub.f32 %v4043_v31, %v2802_v7  ;;  %v2812_v26 = vsub.f32 %v4046_v22, %v2802_v7 }
 0x2a8   : > { %v2805_v14 = vsub.f32 %v2803_v10, %v2804_v11  ;;  %v2813_v12 = vsub.f32 %v2705_v37, %v2802_v7  ;;  %v2814_v27 = vsub.f32 %v2707_v44, %v2802_v7  ;;  %v2815_v28 = vsub.f32 %v3076_v57, %v2802_v7 }
 0x2aa   : > { %v2806_v9 = vmax.f32 %v2805_v14, 0.0 }
 0x2ac   : > { %v2816_v17 = vadd.f32 1e-05, %v2806_v9 }
 0x2ae   : > { %3267 = vrsqrt.f32 %v2816_v17 }
 0x2b8   : > { %v3268_v20 = vpop.eup %3267 }
 0x2b9   : > { %v2818_v29 = vmul.f32 %v3268_v20, %v2807_v19  ;;  %v2819_v23 = vmul.f32 %v3268_v20, %v2808_v21  ;;  %v2820_v30 = vmul.f32 %v3268_v20, %v2809_v24  ;;  %v2821_v32 = vmul.f32 %v3268_v20, %v2810_v25 }
 0x2ba   : > { %v2822_v55 = vmul.f32 %v3268_v20, %v2811_v15  ;;  %v2823_v33 = vmul.f32 %v3268_v20, %v2812_v26  ;;  %v2824_v0 = vmul.f32 %v3268_v20, %v2813_v12  ;;  %v2825_v34 = vmul.f32 %v3268_v20, %v2814_v27 }
 0x2bb   : > { %v2826_v5 = vmul.f32 %v3268_v20, %v2815_v28  ;;  %v2827_v35 = vmul.f32 0.2, %v2818_v29  ;;  %v2828_v13 = vmul.f32 0.2, %v2819_v23  ;;  %v2829_v38 = vmul.f32 0.2, %v2820_v30 }
 0x2bc   : > { %v2830_v31 = vmul.f32 0.2, %v2821_v32  ;;  %v2831_v22 = vmul.f32 0.2, %v2822_v55  ;;  %v2832_v39 = vmul.f32 0.2, %v2823_v33 }
 0x2bd   : > { %v2833_v3 = vmul.f32 0.2, %v2824_v0  ;;  %v2834_v40 = vmul.f32 0.2, %v2825_v34  ;;  %v2835_v36 = vmul.f32 0.2, %v2826_v5  ;;  %v2836_v37 = vmax.f32 %v2818_v29, %v2827_v35 }
 0x2be   : > { %v2837_v42 = vmax.f32 %v2819_v23, %v2828_v13  ;;  %v2838_v18 = vmax.f32 %v2820_v30, %v2829_v38  ;;  %v2839_v44 = vmax.f32 %v2821_v32, %v2830_v31  ;;  %v2840_v46 = vmax.f32 %v2822_v55, %v2831_v22 }
 0x2bf   : > { %v2841_v47 = vmax.f32 %v2823_v33, %v2832_v39  ;;  %v2842_v48 = vmax.f32 %v2824_v0, %v2833_v3  ;;  %v2843_v49 = vmax.f32 %v2825_v34, %v2834_v40  ;;  %v2844_v50 = vmax.f32 %v2826_v5, %v2835_v36  ;;  %2845 = vst [vmem:[%s143_s10] sm:$0xff] %v2836_v37 }
 0x2c0   : > { %2846 = vst [vmem:[%s143_s10 + $0x8] sm:$0xff] %v2837_v42  ;;  %2847 = vst [vmem:[%s143_s10 + $0x10] sm:$0xff] %v2838_v18 }
 0x2c1   : > { %2848 = vst [vmem:[%s143_s10 + $0x18] sm:$0xff] %v2839_v44  ;;  %2849 = vst [vmem:[%s143_s10 + $0x20] sm:$0xff] %v2840_v46 }
 0x2c2   : > { %2850 = vst [vmem:[%s143_s10 + $0x28] sm:$0xff] %v2841_v47  ;;  %2851 = vst [vmem:[%s143_s10 + $0x30] sm:$0xff] %v2842_v48 }
 0x2c3   : > { %2852 = vst [vmem:[%s143_s10 + $0x38] sm:$0xff] %v2843_v49  ;;  %2853 = vst.msk [vmem:[%s143_s10 + $0x40] sm:$0xff] %vm2777_vm15, %v2844_v50 }
 0x2c4 PF: > { %s12_s9 = sadd.s32 1, %s3275_s9  }
 0x2c5   : > { %p9_p4 = scmp.ge.s32.totalorder %s12_s9, 4  }
 0x2c7   :  { %11 = sbr.rel (!%p9_p4) target bundleno = 1 (0x1), region = 58 }

</bundles_post_ra>
